<compile_context>
chip_gen: v6e
topology: v6e:2x2x1
jax: 0.10.0
libtpu: 0.0.40
codegen_flags: <defaults>
</compile_context>

<pallas_src>
import functools

import jax
import jax.numpy as jnp
import numpy as np
from jax.experimental import pallas as pl
from jax.experimental.pallas import tpu as pltpu


def _round_up(x, m):
    return ((x + m - 1) // m) * m


def _convlstm_cell_kernel(x_ref, h_ref, c_ref, wx_ref, wh_ref, b_ref, mask_ref,
                          h_out_ref, c_out_ref, xpad_ref, hpad_ref,
                          *, Bt, Cin, hid, HW, PADL, shifts):
    """Processes `Bt` batch elements per grid step.

    Layout: channels-first with H*W flattened onto the lane axis, so every
    HBM<->VMEM tile, elementwise op and store is lane-dense.

    x_ref    : (Bt, Cin, HW)     bf16
    h_ref    : (Bt, hid, HW)     bf16
    c_ref    : (Bt, hid, HW)     f32
    wx_ref   : (T, 4*hid, Cin)   bf16   per-tap input->gates weights
    wh_ref   : (T, 4*hid, hid)   bf16   per-tap hidden->gates weights
    b_ref    : (4*hid, 1)        f32
    mask_ref : (T, 1, HW)        bf16   per-tap validity mask ('same' padding)
    h_out_ref, c_out_ref : (Bt, hid, HW) f32
    xpad_ref : (Cin, HW + 2*PADL) bf16  zero-halo staging scratch
    hpad_ref : (hid, HW + 2*PADL) bf16  zero-halo staging scratch
    """
    T = len(shifts)

    # Zero the halo margins of the staging buffers once per grid step
    # (VMEM scratch is not zero-initialized; margins are never overwritten).
    if PADL > 0:
        zx = jnp.zeros((Cin, PADL), dtype=xpad_ref.dtype)
        zh = jnp.zeros((hid, PADL), dtype=hpad_ref.dtype)
        xpad_ref[:, 0:PADL] = zx
        xpad_ref[:, PADL + HW:2 * PADL + HW] = zx
        hpad_ref[:, 0:PADL] = zh
        hpad_ref[:, PADL + HW:2 * PADL + HW] = zh

    bias = b_ref[...]  # (4*hid, 1) f32, broadcasts over lanes

    for b in range(Bt):  # static unroll; Bt is small
        # Stage this batch element into the zero-haloed flat buffers
        # (lane-aligned stores: PADL is a multiple of 128, data starts there).
        xpad_ref[:, PADL:PADL + HW] = x_ref[b]
        hpad_ref[:, PADL:PADL + HW] = h_ref[b]

        # 'Same' conv as a sum over kh*kw taps of (4*hid, C)@(C, HW) matmuls on
        # shifted, masked flat views; accumulate in f32 on the MXU.
        acc = jnp.zeros((4 * hid, HW), dtype=jnp.float32)
        for t in range(T):
            start = PADL + shifts[t]
            m = mask_ref[t]                           # (1, HW)
            px = xpad_ref[:, start:start + HW] * m    # (Cin, HW) bf16
            ph = hpad_ref[:, start:start + HW] * m    # (hid, HW) bf16
            acc = acc + jnp.dot(wx_ref[t], px,
                                preferred_element_type=jnp.float32)
            acc = acc + jnp.dot(wh_ref[t], ph,
                                preferred_element_type=jnp.float32)
        acc = acc + bias

        # Gate rows are sublane-aligned blocks; order matches
        # torch.split(combined_conv, hidden_dim, dim=1): i, f, o, g.
        cc_i = acc[0 * hid:1 * hid]
        cc_f = acc[1 * hid:2 * hid]
        cc_o = acc[2 * hid:3 * hid]
        cc_g = acc[3 * hid:4 * hid]

        # sigmoid(x) == 0.5*(tanh(x/2)+1): one EUP push per element instead of
        # exp + divide (largest effect on v5e's single EUP).
        i_g = 0.5 * (jnp.tanh(0.5 * cc_i) + 1.0)
        f_g = 0.5 * (jnp.tanh(0.5 * cc_f) + 1.0)
        o_g = 0.5 * (jnp.tanh(0.5 * cc_o) + 1.0)
        g_g = jnp.tanh(cc_g)

        c_cur = c_ref[b]                               # (hid, HW) f32
        c_nxt = f_g * c_cur + i_g * g_g
        h_nxt = o_g * jnp.tanh(c_nxt)

        h_out_ref[b] = h_nxt
        c_out_ref[b] = c_nxt


def prepare_convlstm_params(weight_oihw, bias, padding, input_dim, hidden_dim,
                            H, W, compute_dtype=jnp.bfloat16):
    """One-time parameter / layout preparation (hoist out of any time loop)."""
    four_hid, C, kh, kw = weight_oihw.shape
    Cin, hid = input_dim, hidden_dim
    assert C == Cin + hid and four_hid == 4 * hid
    p = padding
    # The LSTM state update requires a 'same' convolution.
    assert H + 2 * p - kh + 1 == H and W + 2 * p - kw + 1 == W, \
        "ConvLSTMCell requires a 'same' convolution (output spatial == input)."

    HW = H * W
    # (O, C, kh, kw) -> (kh*kw, O, C), split into input / hidden halves.
    w_taps = jnp.transpose(weight_oihw, (2, 3, 0, 1)).reshape(kh * kw, 4 * hid, C)
    wx = w_taps[:, :, :Cin].astype(compute_dtype)
    wh = w_taps[:, :, Cin:].astype(compute_dtype)
    b2 = bias.reshape(4 * hid, 1).astype(jnp.float32)

    # Per-tap flat-lane shift and validity mask (replaces materializing a
    # spatially zero-padded image in HBM).
    ys, xs = np.meshgrid(np.arange(H), np.arange(W), indexing="ij")
    shifts, masks = [], []
    for ky in range(kh):
        for kx in range(kw):
            dy, dx = ky - p, kx - p
            shifts.append(dy * W + dx)
            valid = ((ys + dy >= 0) & (ys + dy < H) &
                     (xs + dx >= 0) & (xs + dx < W))
            masks.append(valid.reshape(1, HW))
    mask_arr = jnp.asarray(np.stack(masks, 0), dtype=compute_dtype)  # (T,1,HW)

    S = p * W + p                                   # max |flat shift|
    PADL = _round_up(S, 128) if S > 0 else 0        # lane-aligned halo margin

    return dict(wx=wx, wh=wh, b=b2, masks=mask_arr, shifts=tuple(shifts),
                Cin=Cin, hid=hid, H=H, W=W, HW=HW, PADL=PADL, kh=kh, kw=kw,
                compute_dtype=compute_dtype)


def convlstm_cell_apply(params, x_nchw, h_nchw, c_nchw, *, batch_block=1):
    """Applies the ConvLSTM cell. Inputs/outputs are NCHW (like the module)."""
    B = x_nchw.shape[0]
    Cin, hid = params["Cin"], params["hid"]
    H, W, HW, PADL = params["H"], params["W"], params["HW"], params["PADL"]
    T = params["kh"] * params["kw"]
    cd = params["compute_dtype"]

    assert x_nchw.shape == (B, Cin, H, W)
    assert h_nchw.shape == (B, hid, H, W)
    assert c_nchw.shape == (B, hid, H, W)
    Bt = batch_block
    assert B % Bt == 0, "batch_block must divide the batch size"

    # NCHW is already channels-first; flattening H*W onto the lane axis is a
    # free reshape (no transpose, no HBM relayout). bf16 halves x/h traffic.
    xr = x_nchw.reshape(B, Cin, HW).astype(cd)
    hr = h_nchw.reshape(B, hid, HW).astype(cd)
    cr = c_nchw.reshape(B, hid, HW).astype(jnp.float32)

    kernel = functools.partial(
        _convlstm_cell_kernel, Bt=Bt, Cin=Cin, hid=hid, HW=HW, PADL=PADL,
        shifts=params["shifts"])

    h_next, c_next = pl.pallas_call(
        kernel,
        out_shape=(
            jax.ShapeDtypeStruct((B, hid, HW), jnp.float32),
            jax.ShapeDtypeStruct((B, hid, HW), jnp.float32),
        ),
        grid_spec=pltpu.PrefetchScalarGridSpec(
            num_scalar_prefetch=0,
            grid=(B // Bt,),
            in_specs=[
                pl.BlockSpec((Bt, Cin, HW), lambda i: (i, 0, 0)),
                pl.BlockSpec((Bt, hid, HW), lambda i: (i, 0, 0)),
                pl.BlockSpec((Bt, hid, HW), lambda i: (i, 0, 0)),
                pl.BlockSpec((T, 4 * hid, Cin), lambda i: (0, 0, 0)),
                pl.BlockSpec((T, 4 * hid, hid), lambda i: (0, 0, 0)),
                pl.BlockSpec((4 * hid, 1), lambda i: (0, 0)),
                pl.BlockSpec((T, 1, HW), lambda i: (0, 0, 0)),
            ],
            out_specs=[
                pl.BlockSpec((Bt, hid, HW), lambda i: (i, 0, 0)),
                pl.BlockSpec((Bt, hid, HW), lambda i: (i, 0, 0)),
            ],
            scratch_shapes=[
                pltpu.VMEM((Cin, HW + 2 * PADL), cd),
                pltpu.VMEM((hid, HW + 2 * PADL), cd),
            ],
        ),
        compiler_params=pltpu.CompilerParams(
            dimension_semantics=("parallel",)),
    )(xr, hr, cr, params["wx"], params["wh"], params["b"], params["masks"])

    return (h_next.reshape(B, hid, H, W), c_next.reshape(B, hid, H, W))


def convlstm_cell_forward(x_nchw, h_nchw, c_nchw, weight_oihw, bias, padding,
                          *, batch_block=1):
    """One-shot convenience wrapper (param prep + apply)."""
    B, Cin, H, W = x_nchw.shape
    hid = h_nchw.shape[1]
    params = prepare_convlstm_params(weight_oihw, bias, padding, Cin, hid, H, W)
    return convlstm_cell_apply(params, x_nchw, h_nchw, c_nchw,
                               batch_block=batch_block)


def _reference_forward(x, h, c, weight, bias, padding):
    """Pure-JAX f32 reference mirroring the PyTorch module (NCHW)."""
    combined = jnp.concatenate([x, h], axis=1)
    conv = jax.lax.conv_general_dilated(
        combined, weight, window_strides=(1, 1),
        padding=((padding, padding), (padding, padding)),
        dimension_numbers=('NCHW', 'OIHW', 'NCHW'))
    conv = conv + bias[None, :, None, None]
    cc_i, cc_f, cc_o, cc_g = jnp.split(conv, 4, axis=1)
    i = jax.nn.sigmoid(cc_i)
    f = jax.nn.sigmoid(cc_f)
    o = jax.nn.sigmoid(cc_o)
    g = jnp.tanh(cc_g)
    c_next = f * c + i * g
    h_next = o * jnp.tanh(c_next)
    return h_next, c_next


if __name__ == "__main__":
    # Small, deterministic example consistent with the module's __init__.
    B, input_dim, hidden_dim, H, W = 2, 4, 8, 16, 16
    kernel_size, padding = 3, 1
    C = input_dim + hidden_dim

    key = jax.random.PRNGKey(0)
    kx, kh_, kc, kw_, kb = jax.random.split(key, 5)

    x = jax.random.normal(kx, (B, input_dim, H, W), dtype=jnp.float32)
    h_cur = jax.random.normal(kh_, (B, hidden_dim, H, W), dtype=jnp.float32)
    c_cur = jax.random.normal(kc, (B, hidden_dim, H, W), dtype=jnp.float32)

    # Deterministic synthetic parameters (same shapes as nn.Conv2d in __init__).
    weight = 0.1 * jax.random.normal(
        kw_, (4 * hidden_dim, C, kernel_size, kernel_size), dtype=jnp.float32)
    bias = 0.1 * jax.random.normal(kb, (4 * hidden_dim,), dtype=jnp.float32)

    h_next, c_next = convlstm_cell_forward(x, h_cur, c_cur, weight, bias,
                                           padding, batch_block=1)
    jax.block_until_ready((h_next, c_next))

    h_ref, c_ref = _reference_forward(x, h_cur, c_cur, weight, bias, padding)
    assert h_next.shape == (B, hidden_dim, H, W)
    assert c_next.shape == (B, hidden_dim, H, W)
    # bf16 matmul inputs with f32 accumulation / f32 gate math: loosened
    # tolerance vs. the pure-f32 reference.
    assert jnp.allclose(h_next, h_ref, atol=3e-2, rtol=3e-2)
    assert jnp.allclose(c_next, c_ref, atol=3e-2, rtol=3e-2)

    print("KERNEL_OK")
</pallas_src>

<mosaic_0001>
module attributes {stable_mosaic.version = 11 : i64} {
  func.func @_convlstm_cell_kernel(%arg0: i32, %arg1: memref<1x4x256xbf16, #tpu.memory_space<vmem>>, %arg2: memref<1x8x256xbf16, #tpu.memory_space<vmem>>, %arg3: memref<1x8x256xf32, #tpu.memory_space<vmem>>, %arg4: memref<9x32x4xbf16, #tpu.memory_space<vmem>>, %arg5: memref<9x32x8xbf16, #tpu.memory_space<vmem>>, %arg6: memref<32x1xf32, #tpu.memory_space<vmem>>, %arg7: memref<9x1x256xbf16, #tpu.memory_space<vmem>>, %arg8: memref<1x8x256xf32, #tpu.memory_space<vmem>>, %arg9: memref<1x8x256xf32, #tpu.memory_space<vmem>>, %arg10: memref<4x512xbf16, #tpu.memory_space<vmem>>, %arg11: memref<8x512xbf16, #tpu.memory_space<vmem>>) attributes {dimension_semantics = [#tpu.dimension_semantics<parallel>], iteration_bounds = array<i64: 2>, scalar_prefetch = 0 : i64, scratch_operands = 2 : i64, tpu.core_type = #tpu.core_type<tc>, window_params = [{transform_indices = @transform_0, window_bounds = array<i64: 1, 4, 256>}, {transform_indices = @transform_1, window_bounds = array<i64: 1, 8, 256>}, {transform_indices = @transform_2, window_bounds = array<i64: 1, 8, 256>}, {pipeline_mode = #tpu.pipeline_mode<synchronous>, transform_indices = @transform_3, window_bounds = array<i64: 9, 32, 4>}, {pipeline_mode = #tpu.pipeline_mode<synchronous>, transform_indices = @transform_4, window_bounds = array<i64: 9, 32, 8>}, {pipeline_mode = #tpu.pipeline_mode<synchronous>, transform_indices = @transform_5, window_bounds = array<i64: 32, 1>}, {pipeline_mode = #tpu.pipeline_mode<synchronous>, transform_indices = @transform_6, window_bounds = array<i64: 9, 1, 256>}, {transform_indices = @transform_7, window_bounds = array<i64: 1, 8, 256>}, {transform_indices = @transform_8, window_bounds = array<i64: 1, 8, 256>}]} {
    %cst = arith.constant 0.000000e+00 : bf16
    %0 = vector.broadcast %cst : bf16 to vector<4x128xbf16>
    %cst_0 = arith.constant 0.000000e+00 : bf16
    %1 = vector.broadcast %cst_0 : bf16 to vector<8x128xbf16>
    %c0 = arith.constant 0 : index
    %c0_1 = arith.constant 0 : index
    %2 = vector.load %arg10[%c0, %c0_1] : memref<4x512xbf16, #tpu.memory_space<vmem>>, vector<4x128xbf16>
    tpu.vector_store %arg10[%c0, %c0_1], %0 {strides = array<i32>} : memref<4x512xbf16, #tpu.memory_space<vmem>>, vector<4x128xbf16>,
    %c0_2 = arith.constant 0 : index
    %c384 = arith.constant 384 : index
    %3 = vector.load %arg10[%c0_2, %c384] : memref<4x512xbf16, #tpu.memory_space<vmem>>, vector<4x128xbf16>
    tpu.vector_store %arg10[%c0_2, %c384], %0 {strides = array<i32>} : memref<4x512xbf16, #tpu.memory_space<vmem>>, vector<4x128xbf16>,
    %c0_3 = arith.constant 0 : index
    %c0_4 = arith.constant 0 : index
    %4 = vector.load %arg11[%c0_3, %c0_4] : memref<8x512xbf16, #tpu.memory_space<vmem>>, vector<8x128xbf16>
    tpu.vector_store %arg11[%c0_3, %c0_4], %1 {strides = array<i32>} : memref<8x512xbf16, #tpu.memory_space<vmem>>, vector<8x128xbf16>,
    %c0_5 = arith.constant 0 : index
    %c384_6 = arith.constant 384 : index
    %5 = vector.load %arg11[%c0_5, %c384_6] : memref<8x512xbf16, #tpu.memory_space<vmem>>, vector<8x128xbf16>
    tpu.vector_store %arg11[%c0_5, %c384_6], %1 {strides = array<i32>} : memref<8x512xbf16, #tpu.memory_space<vmem>>, vector<8x128xbf16>,
    %c0_7 = arith.constant 0 : index
    %c0_8 = arith.constant 0 : index
    %6 = vector.load %arg6[%c0_7, %c0_8] : memref<32x1xf32, #tpu.memory_space<vmem>>, vector<32x1xf32>
    %c0_9 = arith.constant 0 : index
    %c0_10 = arith.constant 0 : index
    %c0_11 = arith.constant 0 : index
    %7 = vector.load %arg1[%c0_9, %c0_10, %c0_11] : memref<1x4x256xbf16, #tpu.memory_space<vmem>>, vector<1x4x256xbf16>
    %8 = vector.shape_cast %7 : vector<1x4x256xbf16> to vector<4x256xbf16>
    %c0_12 = arith.constant 0 : index
    %c128 = arith.constant 128 : index
    %9 = vector.load %arg10[%c0_12, %c128] : memref<4x512xbf16, #tpu.memory_space<vmem>>, vector<4x256xbf16>
    tpu.vector_store %arg10[%c0_12, %c128], %8 {strides = array<i32>} : memref<4x512xbf16, #tpu.memory_space<vmem>>, vector<4x256xbf16>,
    %c0_13 = arith.constant 0 : index
    %c0_14 = arith.constant 0 : index
    %c0_15 = arith.constant 0 : index
    %10 = vector.load %arg2[%c0_13, %c0_14, %c0_15] : memref<1x8x256xbf16, #tpu.memory_space<vmem>>, vector<1x8x256xbf16>
    %11 = vector.shape_cast %10 : vector<1x8x256xbf16> to vector<8x256xbf16>
    %c0_16 = arith.constant 0 : index
    %c128_17 = arith.constant 128 : index
    %12 = vector.load %arg11[%c0_16, %c128_17] : memref<8x512xbf16, #tpu.memory_space<vmem>>, vector<8x256xbf16>
    tpu.vector_store %arg11[%c0_16, %c128_17], %11 {strides = array<i32>} : memref<8x512xbf16, #tpu.memory_space<vmem>>, vector<8x256xbf16>,
    %cst_18 = arith.constant 0.000000e+00 : f32
    %13 = vector.broadcast %cst_18 : f32 to vector<32x256xf32>
    %c0_19 = arith.constant 0 : index
    %c0_20 = arith.constant 0 : index
    %c0_21 = arith.constant 0 : index
    %14 = vector.load %arg7[%c0_19, %c0_20, %c0_21] : memref<9x1x256xbf16, #tpu.memory_space<vmem>>, vector<1x1x256xbf16>
    %15 = vector.shape_cast %14 : vector<1x1x256xbf16> to vector<1x256xbf16>
    %c0_22 = arith.constant 0 : index
    %c111 = arith.constant 111 : index
    %16 = vector.load %arg10[%c0_22, %c111] : memref<4x512xbf16, #tpu.memory_space<vmem>>, vector<4x256xbf16>
    %17 = vector.broadcast %15 : vector<1x256xbf16> to vector<4x256xbf16>
    %18 = arith.mulf %16, %17 : vector<4x256xbf16>
    %c0_23 = arith.constant 0 : index
    %c111_24 = arith.constant 111 : index
    %19 = vector.load %arg11[%c0_23, %c111_24] : memref<8x512xbf16, #tpu.memory_space<vmem>>, vector<8x256xbf16>
    %20 = vector.broadcast %15 : vector<1x256xbf16> to vector<8x256xbf16>
    %21 = arith.mulf %19, %20 : vector<8x256xbf16>
    %c0_25 = arith.constant 0 : index
    %c0_26 = arith.constant 0 : index
    %c0_27 = arith.constant 0 : index
    %22 = vector.load %arg4[%c0_25, %c0_26, %c0_27] : memref<9x32x4xbf16, #tpu.memory_space<vmem>>, vector<1x32x4xbf16>
    %23 = vector.shape_cast %22 : vector<1x32x4xbf16> to vector<32x4xbf16>
    %cst_28 = arith.constant dense<0.000000e+00> : vector<32x256xf32>
    %24 = tpu.matmul %23, %18, %cst_28 {dimension_numbers = #tpu.dot_dimension_numbers<[1], [0], [0], [1], [0, 0, 1, 1], [], []>} : vector<32x4xbf16>, vector<4x256xbf16>, vector<32x256xf32> -> vector<32x256xf32>
    %25 = arith.addf %13, %24 : vector<32x256xf32>
    %c0_29 = arith.constant 0 : index
    %c0_30 = arith.constant 0 : index
    %c0_31 = arith.constant 0 : index
    %26 = vector.load %arg5[%c0_29, %c0_30, %c0_31] : memref<9x32x8xbf16, #tpu.memory_space<vmem>>, vector<1x32x8xbf16>
    %27 = vector.shape_cast %26 : vector<1x32x8xbf16> to vector<32x8xbf16>
    %cst_32 = arith.constant dense<0.000000e+00> : vector<32x256xf32>
    %28 = tpu.matmul %27, %21, %cst_32 {dimension_numbers = #tpu.dot_dimension_numbers<[1], [0], [0], [1], [0, 0, 1, 1], [], []>} : vector<32x8xbf16>, vector<8x256xbf16>, vector<32x256xf32> -> vector<32x256xf32>
    %29 = arith.addf %25, %28 : vector<32x256xf32>
    %c1 = arith.constant 1 : index
    %c0_33 = arith.constant 0 : index
    %c0_34 = arith.constant 0 : index
    %30 = vector.load %arg7[%c1, %c0_33, %c0_34] : memref<9x1x256xbf16, #tpu.memory_space<vmem>>, vector<1x1x256xbf16>
    %31 = vector.shape_cast %30 : vector<1x1x256xbf16> to vector<1x256xbf16>
    %c0_35 = arith.constant 0 : index
    %c112 = arith.constant 112 : index
    %32 = vector.load %arg10[%c0_35, %c112] : memref<4x512xbf16, #tpu.memory_space<vmem>>, vector<4x256xbf16>
    %33 = vector.broadcast %31 : vector<1x256xbf16> to vector<4x256xbf16>
    %34 = arith.mulf %32, %33 : vector<4x256xbf16>
    %c0_36 = arith.constant 0 : index
    %c112_37 = arith.constant 112 : index
    %35 = vector.load %arg11[%c0_36, %c112_37] : memref<8x512xbf16, #tpu.memory_space<vmem>>, vector<8x256xbf16>
    %36 = vector.broadcast %31 : vector<1x256xbf16> to vector<8x256xbf16>
    %37 = arith.mulf %35, %36 : vector<8x256xbf16>
    %c1_38 = arith.constant 1 : index
    %c0_39 = arith.constant 0 : index
    %c0_40 = arith.constant 0 : index
    %38 = vector.load %arg4[%c1_38, %c0_39, %c0_40] : memref<9x32x4xbf16, #tpu.memory_space<vmem>>, vector<1x32x4xbf16>
    %39 = vector.shape_cast %38 : vector<1x32x4xbf16> to vector<32x4xbf16>
    %cst_41 = arith.constant dense<0.000000e+00> : vector<32x256xf32>
    %40 = tpu.matmul %39, %34, %cst_41 {dimension_numbers = #tpu.dot_dimension_numbers<[1], [0], [0], [1], [0, 0, 1, 1], [], []>} : vector<32x4xbf16>, vector<4x256xbf16>, vector<32x256xf32> -> vector<32x256xf32>
    %41 = arith.addf %29, %40 : vector<32x256xf32>
    %c1_42 = arith.constant 1 : index
    %c0_43 = arith.constant 0 : index
    %c0_44 = arith.constant 0 : index
    %42 = vector.load %arg5[%c1_42, %c0_43, %c0_44] : memref<9x32x8xbf16, #tpu.memory_space<vmem>>, vector<1x32x8xbf16>
    %43 = vector.shape_cast %42 : vector<1x32x8xbf16> to vector<32x8xbf16>
    %cst_45 = arith.constant dense<0.000000e+00> : vector<32x256xf32>
    %44 = tpu.matmul %43, %37, %cst_45 {dimension_numbers = #tpu.dot_dimension_numbers<[1], [0], [0], [1], [0, 0, 1, 1], [], []>} : vector<32x8xbf16>, vector<8x256xbf16>, vector<32x256xf32> -> vector<32x256xf32>
    %45 = arith.addf %41, %44 : vector<32x256xf32>
    %c2 = arith.constant 2 : index
    %c0_46 = arith.constant 0 : index
    %c0_47 = arith.constant 0 : index
    %46 = vector.load %arg7[%c2, %c0_46, %c0_47] : memref<9x1x256xbf16, #tpu.memory_space<vmem>>, vector<1x1x256xbf16>
    %47 = vector.shape_cast %46 : vector<1x1x256xbf16> to vector<1x256xbf16>
    %c0_48 = arith.constant 0 : index
    %c113 = arith.constant 113 : index
    %48 = vector.load %arg10[%c0_48, %c113] : memref<4x512xbf16, #tpu.memory_space<vmem>>, vector<4x256xbf16>
    %49 = vector.broadcast %47 : vector<1x256xbf16> to vector<4x256xbf16>
    %50 = arith.mulf %48, %49 : vector<4x256xbf16>
    %c0_49 = arith.constant 0 : index
    %c113_50 = arith.constant 113 : index
    %51 = vector.load %arg11[%c0_49, %c113_50] : memref<8x512xbf16, #tpu.memory_space<vmem>>, vector<8x256xbf16>
    %52 = vector.broadcast %47 : vector<1x256xbf16> to vector<8x256xbf16>
    %53 = arith.mulf %51, %52 : vector<8x256xbf16>
    %c2_51 = arith.constant 2 : index
    %c0_52 = arith.constant 0 : index
    %c0_53 = arith.constant 0 : index
    %54 = vector.load %arg4[%c2_51, %c0_52, %c0_53] : memref<9x32x4xbf16, #tpu.memory_space<vmem>>, vector<1x32x4xbf16>
    %55 = vector.shape_cast %54 : vector<1x32x4xbf16> to vector<32x4xbf16>
    %cst_54 = arith.constant dense<0.000000e+00> : vector<32x256xf32>
    %56 = tpu.matmul %55, %50, %cst_54 {dimension_numbers = #tpu.dot_dimension_numbers<[1], [0], [0], [1], [0, 0, 1, 1], [], []>} : vector<32x4xbf16>, vector<4x256xbf16>, vector<32x256xf32> -> vector<32x256xf32>
    %57 = arith.addf %45, %56 : vector<32x256xf32>
    %c2_55 = arith.constant 2 : index
    %c0_56 = arith.constant 0 : index
    %c0_57 = arith.constant 0 : index
    %58 = vector.load %arg5[%c2_55, %c0_56, %c0_57] : memref<9x32x8xbf16, #tpu.memory_space<vmem>>, vector<1x32x8xbf16>
    %59 = vector.shape_cast %58 : vector<1x32x8xbf16> to vector<32x8xbf16>
    %cst_58 = arith.constant dense<0.000000e+00> : vector<32x256xf32>
    %60 = tpu.matmul %59, %53, %cst_58 {dimension_numbers = #tpu.dot_dimension_numbers<[1], [0], [0], [1], [0, 0, 1, 1], [], []>} : vector<32x8xbf16>, vector<8x256xbf16>, vector<32x256xf32> -> vector<32x256xf32>
    %61 = arith.addf %57, %60 : vector<32x256xf32>
    %c3 = arith.constant 3 : index
    %c0_59 = arith.constant 0 : index
    %c0_60 = arith.constant 0 : index
    %62 = vector.load %arg7[%c3, %c0_59, %c0_60] : memref<9x1x256xbf16, #tpu.memory_space<vmem>>, vector<1x1x256xbf16>
    %63 = vector.shape_cast %62 : vector<1x1x256xbf16> to vector<1x256xbf16>
    %c0_61 = arith.constant 0 : index
    %c127 = arith.constant 127 : index
    %64 = vector.load %arg10[%c0_61, %c127] : memref<4x512xbf16, #tpu.memory_space<vmem>>, vector<4x256xbf16>
    %65 = vector.broadcast %63 : vector<1x256xbf16> to vector<4x256xbf16>
    %66 = arith.mulf %64, %65 : vector<4x256xbf16>
    %c0_62 = arith.constant 0 : index
    %c127_63 = arith.constant 127 : index
    %67 = vector.load %arg11[%c0_62, %c127_63] : memref<8x512xbf16, #tpu.memory_space<vmem>>, vector<8x256xbf16>
    %68 = vector.broadcast %63 : vector<1x256xbf16> to vector<8x256xbf16>
    %69 = arith.mulf %67, %68 : vector<8x256xbf16>
    %c3_64 = arith.constant 3 : index
    %c0_65 = arith.constant 0 : index
    %c0_66 = arith.constant 0 : index
    %70 = vector.load %arg4[%c3_64, %c0_65, %c0_66] : memref<9x32x4xbf16, #tpu.memory_space<vmem>>, vector<1x32x4xbf16>
    %71 = vector.shape_cast %70 : vector<1x32x4xbf16> to vector<32x4xbf16>
    %cst_67 = arith.constant dense<0.000000e+00> : vector<32x256xf32>
    %72 = tpu.matmul %71, %66, %cst_67 {dimension_numbers = #tpu.dot_dimension_numbers<[1], [0], [0], [1], [0, 0, 1, 1], [], []>} : vector<32x4xbf16>, vector<4x256xbf16>, vector<32x256xf32> -> vector<32x256xf32>
    %73 = arith.addf %61, %72 : vector<32x256xf32>
    %c3_68 = arith.constant 3 : index
    %c0_69 = arith.constant 0 : index
    %c0_70 = arith.constant 0 : index
    %74 = vector.load %arg5[%c3_68, %c0_69, %c0_70] : memref<9x32x8xbf16, #tpu.memory_space<vmem>>, vector<1x32x8xbf16>
    %75 = vector.shape_cast %74 : vector<1x32x8xbf16> to vector<32x8xbf16>
    %cst_71 = arith.constant dense<0.000000e+00> : vector<32x256xf32>
    %76 = tpu.matmul %75, %69, %cst_71 {dimension_numbers = #tpu.dot_dimension_numbers<[1], [0], [0], [1], [0, 0, 1, 1], [], []>} : vector<32x8xbf16>, vector<8x256xbf16>, vector<32x256xf32> -> vector<32x256xf32>
    %77 = arith.addf %73, %76 : vector<32x256xf32>
    %c4 = arith.constant 4 : index
    %c0_72 = arith.constant 0 : index
    %c0_73 = arith.constant 0 : index
    %78 = vector.load %arg7[%c4, %c0_72, %c0_73] : memref<9x1x256xbf16, #tpu.memory_space<vmem>>, vector<1x1x256xbf16>
    %79 = vector.shape_cast %78 : vector<1x1x256xbf16> to vector<1x256xbf16>
    %c0_74 = arith.constant 0 : index
    %c128_75 = arith.constant 128 : index
    %80 = vector.load %arg10[%c0_74, %c128_75] : memref<4x512xbf16, #tpu.memory_space<vmem>>, vector<4x256xbf16>
    %81 = vector.broadcast %79 : vector<1x256xbf16> to vector<4x256xbf16>
    %82 = arith.mulf %80, %81 : vector<4x256xbf16>
    %c0_76 = arith.constant 0 : index
    %c128_77 = arith.constant 128 : index
    %83 = vector.load %arg11[%c0_76, %c128_77] : memref<8x512xbf16, #tpu.memory_space<vmem>>, vector<8x256xbf16>
    %84 = vector.broadcast %79 : vector<1x256xbf16> to vector<8x256xbf16>
    %85 = arith.mulf %83, %84 : vector<8x256xbf16>
    %c4_78 = arith.constant 4 : index
    %c0_79 = arith.constant 0 : index
    %c0_80 = arith.constant 0 : index
    %86 = vector.load %arg4[%c4_78, %c0_79, %c0_80] : memref<9x32x4xbf16, #tpu.memory_space<vmem>>, vector<1x32x4xbf16>
    %87 = vector.shape_cast %86 : vector<1x32x4xbf16> to vector<32x4xbf16>
    %cst_81 = arith.constant dense<0.000000e+00> : vector<32x256xf32>
    %88 = tpu.matmul %87, %82, %cst_81 {dimension_numbers = #tpu.dot_dimension_numbers<[1], [0], [0], [1], [0, 0, 1, 1], [], []>} : vector<32x4xbf16>, vector<4x256xbf16>, vector<32x256xf32> -> vector<32x256xf32>
    %89 = arith.addf %77, %88 : vector<32x256xf32>
    %c4_82 = arith.constant 4 : index
    %c0_83 = arith.constant 0 : index
    %c0_84 = arith.constant 0 : index
    %90 = vector.load %arg5[%c4_82, %c0_83, %c0_84] : memref<9x32x8xbf16, #tpu.memory_space<vmem>>, vector<1x32x8xbf16>
    %91 = vector.shape_cast %90 : vector<1x32x8xbf16> to vector<32x8xbf16>
    %cst_85 = arith.constant dense<0.000000e+00> : vector<32x256xf32>
    %92 = tpu.matmul %91, %85, %cst_85 {dimension_numbers = #tpu.dot_dimension_numbers<[1], [0], [0], [1], [0, 0, 1, 1], [], []>} : vector<32x8xbf16>, vector<8x256xbf16>, vector<32x256xf32> -> vector<32x256xf32>
    %93 = arith.addf %89, %92 : vector<32x256xf32>
    %c5 = arith.constant 5 : index
    %c0_86 = arith.constant 0 : index
    %c0_87 = arith.constant 0 : index
    %94 = vector.load %arg7[%c5, %c0_86, %c0_87] : memref<9x1x256xbf16, #tpu.memory_space<vmem>>, vector<1x1x256xbf16>
    %95 = vector.shape_cast %94 : vector<1x1x256xbf16> to vector<1x256xbf16>
    %c0_88 = arith.constant 0 : index
    %c129 = arith.constant 129 : index
    %96 = vector.load %arg10[%c0_88, %c129] : memref<4x512xbf16, #tpu.memory_space<vmem>>, vector<4x256xbf16>
    %97 = vector.broadcast %95 : vector<1x256xbf16> to vector<4x256xbf16>
    %98 = arith.mulf %96, %97 : vector<4x256xbf16>
    %c0_89 = arith.constant 0 : index
    %c129_90 = arith.constant 129 : index
    %99 = vector.load %arg11[%c0_89, %c129_90] : memref<8x512xbf16, #tpu.memory_space<vmem>>, vector<8x256xbf16>
    %100 = vector.broadcast %95 : vector<1x256xbf16> to vector<8x256xbf16>
    %101 = arith.mulf %99, %100 : vector<8x256xbf16>
    %c5_91 = arith.constant 5 : index
    %c0_92 = arith.constant 0 : index
    %c0_93 = arith.constant 0 : index
    %102 = vector.load %arg4[%c5_91, %c0_92, %c0_93] : memref<9x32x4xbf16, #tpu.memory_space<vmem>>, vector<1x32x4xbf16>
    %103 = vector.shape_cast %102 : vector<1x32x4xbf16> to vector<32x4xbf16>
    %cst_94 = arith.constant dense<0.000000e+00> : vector<32x256xf32>
    %104 = tpu.matmul %103, %98, %cst_94 {dimension_numbers = #tpu.dot_dimension_numbers<[1], [0], [0], [1], [0, 0, 1, 1], [], []>} : vector<32x4xbf16>, vector<4x256xbf16>, vector<32x256xf32> -> vector<32x256xf32>
    %105 = arith.addf %93, %104 : vector<32x256xf32>
    %c5_95 = arith.constant 5 : index
    %c0_96 = arith.constant 0 : index
    %c0_97 = arith.constant 0 : index
    %106 = vector.load %arg5[%c5_95, %c0_96, %c0_97] : memref<9x32x8xbf16, #tpu.memory_space<vmem>>, vector<1x32x8xbf16>
    %107 = vector.shape_cast %106 : vector<1x32x8xbf16> to vector<32x8xbf16>
    %cst_98 = arith.constant dense<0.000000e+00> : vector<32x256xf32>
    %108 = tpu.matmul %107, %101, %cst_98 {dimension_numbers = #tpu.dot_dimension_numbers<[1], [0], [0], [1], [0, 0, 1, 1], [], []>} : vector<32x8xbf16>, vector<8x256xbf16>, vector<32x256xf32> -> vector<32x256xf32>
    %109 = arith.addf %105, %108 : vector<32x256xf32>
    %c6 = arith.constant 6 : index
    %c0_99 = arith.constant 0 : index
    %c0_100 = arith.constant 0 : index
    %110 = vector.load %arg7[%c6, %c0_99, %c0_100] : memref<9x1x256xbf16, #tpu.memory_space<vmem>>, vector<1x1x256xbf16>
    %111 = vector.shape_cast %110 : vector<1x1x256xbf16> to vector<1x256xbf16>
    %c0_101 = arith.constant 0 : index
    %c143 = arith.constant 143 : index
    %112 = vector.load %arg10[%c0_101, %c143] : memref<4x512xbf16, #tpu.memory_space<vmem>>, vector<4x256xbf16>
    %113 = vector.broadcast %111 : vector<1x256xbf16> to vector<4x256xbf16>
    %114 = arith.mulf %112, %113 : vector<4x256xbf16>
    %c0_102 = arith.constant 0 : index
    %c143_103 = arith.constant 143 : index
    %115 = vector.load %arg11[%c0_102, %c143_103] : memref<8x512xbf16, #tpu.memory_space<vmem>>, vector<8x256xbf16>
    %116 = vector.broadcast %111 : vector<1x256xbf16> to vector<8x256xbf16>
    %117 = arith.mulf %115, %116 : vector<8x256xbf16>
    %c6_104 = arith.constant 6 : index
    %c0_105 = arith.constant 0 : index
    %c0_106 = arith.constant 0 : index
    %118 = vector.load %arg4[%c6_104, %c0_105, %c0_106] : memref<9x32x4xbf16, #tpu.memory_space<vmem>>, vector<1x32x4xbf16>
    %119 = vector.shape_cast %118 : vector<1x32x4xbf16> to vector<32x4xbf16>
    %cst_107 = arith.constant dense<0.000000e+00> : vector<32x256xf32>
    %120 = tpu.matmul %119, %114, %cst_107 {dimension_numbers = #tpu.dot_dimension_numbers<[1], [0], [0], [1], [0, 0, 1, 1], [], []>} : vector<32x4xbf16>, vector<4x256xbf16>, vector<32x256xf32> -> vector<32x256xf32>
    %121 = arith.addf %109, %120 : vector<32x256xf32>
    %c6_108 = arith.constant 6 : index
    %c0_109 = arith.constant 0 : index
    %c0_110 = arith.constant 0 : index
    %122 = vector.load %arg5[%c6_108, %c0_109, %c0_110] : memref<9x32x8xbf16, #tpu.memory_space<vmem>>, vector<1x32x8xbf16>
    %123 = vector.shape_cast %122 : vector<1x32x8xbf16> to vector<32x8xbf16>
    %cst_111 = arith.constant dense<0.000000e+00> : vector<32x256xf32>
    %124 = tpu.matmul %123, %117, %cst_111 {dimension_numbers = #tpu.dot_dimension_numbers<[1], [0], [0], [1], [0, 0, 1, 1], [], []>} : vector<32x8xbf16>, vector<8x256xbf16>, vector<32x256xf32> -> vector<32x256xf32>
    %125 = arith.addf %121, %124 : vector<32x256xf32>
    %c7 = arith.constant 7 : index
    %c0_112 = arith.constant 0 : index
    %c0_113 = arith.constant 0 : index
    %126 = vector.load %arg7[%c7, %c0_112, %c0_113] : memref<9x1x256xbf16, #tpu.memory_space<vmem>>, vector<1x1x256xbf16>
    %127 = vector.shape_cast %126 : vector<1x1x256xbf16> to vector<1x256xbf16>
    %c0_114 = arith.constant 0 : index
    %c144 = arith.constant 144 : index
    %128 = vector.load %arg10[%c0_114, %c144] : memref<4x512xbf16, #tpu.memory_space<vmem>>, vector<4x256xbf16>
    %129 = vector.broadcast %127 : vector<1x256xbf16> to vector<4x256xbf16>
    %130 = arith.mulf %128, %129 : vector<4x256xbf16>
    %c0_115 = arith.constant 0 : index
    %c144_116 = arith.constant 144 : index
    %131 = vector.load %arg11[%c0_115, %c144_116] : memref<8x512xbf16, #tpu.memory_space<vmem>>, vector<8x256xbf16>
    %132 = vector.broadcast %127 : vector<1x256xbf16> to vector<8x256xbf16>
    %133 = arith.mulf %131, %132 : vector<8x256xbf16>
    %c7_117 = arith.constant 7 : index
    %c0_118 = arith.constant 0 : index
    %c0_119 = arith.constant 0 : index
    %134 = vector.load %arg4[%c7_117, %c0_118, %c0_119] : memref<9x32x4xbf16, #tpu.memory_space<vmem>>, vector<1x32x4xbf16>
    %135 = vector.shape_cast %134 : vector<1x32x4xbf16> to vector<32x4xbf16>
    %cst_120 = arith.constant dense<0.000000e+00> : vector<32x256xf32>
    %136 = tpu.matmul %135, %130, %cst_120 {dimension_numbers = #tpu.dot_dimension_numbers<[1], [0], [0], [1], [0, 0, 1, 1], [], []>} : vector<32x4xbf16>, vector<4x256xbf16>, vector<32x256xf32> -> vector<32x256xf32>
    %137 = arith.addf %125, %136 : vector<32x256xf32>
    %c7_121 = arith.constant 7 : index
    %c0_122 = arith.constant 0 : index
    %c0_123 = arith.constant 0 : index
    %138 = vector.load %arg5[%c7_121, %c0_122, %c0_123] : memref<9x32x8xbf16, #tpu.memory_space<vmem>>, vector<1x32x8xbf16>
    %139 = vector.shape_cast %138 : vector<1x32x8xbf16> to vector<32x8xbf16>
    %cst_124 = arith.constant dense<0.000000e+00> : vector<32x256xf32>
    %140 = tpu.matmul %139, %133, %cst_124 {dimension_numbers = #tpu.dot_dimension_numbers<[1], [0], [0], [1], [0, 0, 1, 1], [], []>} : vector<32x8xbf16>, vector<8x256xbf16>, vector<32x256xf32> -> vector<32x256xf32>
    %141 = arith.addf %137, %140 : vector<32x256xf32>
    %c8 = arith.constant 8 : index
    %c0_125 = arith.constant 0 : index
    %c0_126 = arith.constant 0 : index
    %142 = vector.load %arg7[%c8, %c0_125, %c0_126] : memref<9x1x256xbf16, #tpu.memory_space<vmem>>, vector<1x1x256xbf16>
    %143 = vector.shape_cast %142 : vector<1x1x256xbf16> to vector<1x256xbf16>
    %c0_127 = arith.constant 0 : index
    %c145 = arith.constant 145 : index
    %144 = vector.load %arg10[%c0_127, %c145] : memref<4x512xbf16, #tpu.memory_space<vmem>>, vector<4x256xbf16>
    %145 = vector.broadcast %143 : vector<1x256xbf16> to vector<4x256xbf16>
    %146 = arith.mulf %144, %145 : vector<4x256xbf16>
    %c0_128 = arith.constant 0 : index
    %c145_129 = arith.constant 145 : index
    %147 = vector.load %arg11[%c0_128, %c145_129] : memref<8x512xbf16, #tpu.memory_space<vmem>>, vector<8x256xbf16>
    %148 = vector.broadcast %143 : vector<1x256xbf16> to vector<8x256xbf16>
    %149 = arith.mulf %147, %148 : vector<8x256xbf16>
    %c8_130 = arith.constant 8 : index
    %c0_131 = arith.constant 0 : index
    %c0_132 = arith.constant 0 : index
    %150 = vector.load %arg4[%c8_130, %c0_131, %c0_132] : memref<9x32x4xbf16, #tpu.memory_space<vmem>>, vector<1x32x4xbf16>
    %151 = vector.shape_cast %150 : vector<1x32x4xbf16> to vector<32x4xbf16>
    %cst_133 = arith.constant dense<0.000000e+00> : vector<32x256xf32>
    %152 = tpu.matmul %151, %146, %cst_133 {dimension_numbers = #tpu.dot_dimension_numbers<[1], [0], [0], [1], [0, 0, 1, 1], [], []>} : vector<32x4xbf16>, vector<4x256xbf16>, vector<32x256xf32> -> vector<32x256xf32>
    %153 = arith.addf %141, %152 : vector<32x256xf32>
    %c8_134 = arith.constant 8 : index
    %c0_135 = arith.constant 0 : index
    %c0_136 = arith.constant 0 : index
    %154 = vector.load %arg5[%c8_134, %c0_135, %c0_136] : memref<9x32x8xbf16, #tpu.memory_space<vmem>>, vector<1x32x8xbf16>
    %155 = vector.shape_cast %154 : vector<1x32x8xbf16> to vector<32x8xbf16>
    %cst_137 = arith.constant dense<0.000000e+00> : vector<32x256xf32>
    %156 = tpu.matmul %155, %149, %cst_137 {dimension_numbers = #tpu.dot_dimension_numbers<[1], [0], [0], [1], [0, 0, 1, 1], [], []>} : vector<32x8xbf16>, vector<8x256xbf16>, vector<32x256xf32> -> vector<32x256xf32>
    %157 = arith.addf %153, %156 : vector<32x256xf32>
    %158 = vector.broadcast %6 : vector<32x1xf32> to vector<32x256xf32>
    %159 = arith.addf %157, %158 : vector<32x256xf32>
    %160 = vector.extract_strided_slice %159 {offsets = [0, 0], sizes = [8, 256], strides = [1, 1]} : vector<32x256xf32> to vector<8x256xf32>
    %161 = vector.extract_strided_slice %159 {offsets = [8, 0], sizes = [8, 256], strides = [1, 1]} : vector<32x256xf32> to vector<8x256xf32>
    %162 = vector.extract_strided_slice %159 {offsets = [16, 0], sizes = [8, 256], strides = [1, 1]} : vector<32x256xf32> to vector<8x256xf32>
    %163 = vector.extract_strided_slice %159 {offsets = [24, 0], sizes = [8, 256], strides = [1, 1]} : vector<32x256xf32> to vector<8x256xf32>
    %cst_138 = arith.constant 5.000000e-01 : f32
    %164 = vector.broadcast %cst_138 : f32 to vector<8x256xf32>
    %165 = arith.mulf %164, %160 : vector<8x256xf32>
    %166 = math.tanh %165 : vector<8x256xf32>
    %cst_139 = arith.constant 1.000000e+00 : f32
    %167 = vector.broadcast %cst_139 : f32 to vector<8x256xf32>
    %168 = arith.addf %166, %167 : vector<8x256xf32>
    %cst_140 = arith.constant 5.000000e-01 : f32
    %169 = vector.broadcast %cst_140 : f32 to vector<8x256xf32>
    %170 = arith.mulf %169, %168 : vector<8x256xf32>
    %cst_141 = arith.constant 5.000000e-01 : f32
    %171 = vector.broadcast %cst_141 : f32 to vector<8x256xf32>
    %172 = arith.mulf %171, %161 : vector<8x256xf32>
    %173 = math.tanh %172 : vector<8x256xf32>
    %cst_142 = arith.constant 1.000000e+00 : f32
    %174 = vector.broadcast %cst_142 : f32 to vector<8x256xf32>
    %175 = arith.addf %173, %174 : vector<8x256xf32>
    %cst_143 = arith.constant 5.000000e-01 : f32
    %176 = vector.broadcast %cst_143 : f32 to vector<8x256xf32>
    %177 = arith.mulf %176, %175 : vector<8x256xf32>
    %cst_144 = arith.constant 5.000000e-01 : f32
    %178 = vector.broadcast %cst_144 : f32 to vector<8x256xf32>
    %179 = arith.mulf %178, %162 : vector<8x256xf32>
    %180 = math.tanh %179 : vector<8x256xf32>
    %cst_145 = arith.constant 1.000000e+00 : f32
    %181 = vector.broadcast %cst_145 : f32 to vector<8x256xf32>
    %182 = arith.addf %180, %181 : vector<8x256xf32>
    %cst_146 = arith.constant 5.000000e-01 : f32
    %183 = vector.broadcast %cst_146 : f32 to vector<8x256xf32>
    %184 = arith.mulf %183, %182 : vector<8x256xf32>
    %185 = math.tanh %163 : vector<8x256xf32>
    %c0_147 = arith.constant 0 : index
    %c0_148 = arith.constant 0 : index
    %c0_149 = arith.constant 0 : index
    %186 = vector.load %arg3[%c0_147, %c0_148, %c0_149] : memref<1x8x256xf32, #tpu.memory_space<vmem>>, vector<1x8x256xf32>
    %187 = vector.shape_cast %186 : vector<1x8x256xf32> to vector<8x256xf32>
    %188 = arith.mulf %177, %187 : vector<8x256xf32>
    %189 = arith.mulf %170, %185 : vector<8x256xf32>
    %190 = arith.addf %188, %189 : vector<8x256xf32>
    %191 = math.tanh %190 : vector<8x256xf32>
    %192 = arith.mulf %184, %191 : vector<8x256xf32>
    %c0_150 = arith.constant 0 : index
    %c0_151 = arith.constant 0 : index
    %c0_152 = arith.constant 0 : index
    %193 = vector.load %arg8[%c0_150, %c0_151, %c0_152] : memref<1x8x256xf32, #tpu.memory_space<vmem>>, vector<1x8x256xf32>
    %194 = vector.shape_cast %193 : vector<1x8x256xf32> to vector<8x256xf32>
    %195 = vector.shape_cast %192 : vector<8x256xf32> to vector<1x8x256xf32>
    tpu.vector_store %arg8[%c0_150, %c0_151, %c0_152], %195 {strides = array<i32>} : memref<1x8x256xf32, #tpu.memory_space<vmem>>, vector<1x8x256xf32>,
    %c0_153 = arith.constant 0 : index
    %c0_154 = arith.constant 0 : index
    %c0_155 = arith.constant 0 : index
    %196 = vector.load %arg9[%c0_153, %c0_154, %c0_155] : memref<1x8x256xf32, #tpu.memory_space<vmem>>, vector<1x8x256xf32>
    %197 = vector.shape_cast %196 : vector<1x8x256xf32> to vector<8x256xf32>
    %198 = vector.shape_cast %190 : vector<8x256xf32> to vector<1x8x256xf32>
    tpu.vector_store %arg9[%c0_153, %c0_154, %c0_155], %198 {strides = array<i32>} : memref<1x8x256xf32, #tpu.memory_space<vmem>>, vector<1x8x256xf32>,
    return
  }
  func.func @transform_0(%arg0: i32) -> (i32, i32, i32) {
    %c0_i32 = arith.constant 0 : i32
    %c0_i32_0 = arith.constant 0 : i32
    %c0_i32_1 = arith.constant 0 : i32
    return %arg0, %c0_i32, %c0_i32_0 : i32, i32, i32
  }
  func.func @transform_1(%arg0: i32) -> (i32, i32, i32) {
    %c0_i32 = arith.constant 0 : i32
    %c0_i32_0 = arith.constant 0 : i32
    %c0_i32_1 = arith.constant 0 : i32
    return %arg0, %c0_i32, %c0_i32_0 : i32, i32, i32
  }
  func.func @transform_2(%arg0: i32) -> (i32, i32, i32) {
    %c0_i32 = arith.constant 0 : i32
    %c0_i32_0 = arith.constant 0 : i32
    %c0_i32_1 = arith.constant 0 : i32
    return %arg0, %c0_i32, %c0_i32_0 : i32, i32, i32
  }
  func.func @transform_3(%arg0: i32) -> (i32, i32, i32) {
    %c0_i32 = arith.constant 0 : i32
    %c0_i32_0 = arith.constant 0 : i32
    %c0_i32_1 = arith.constant 0 : i32
    %c0_i32_2 = arith.constant 0 : i32
    return %c0_i32, %c0_i32_0, %c0_i32_1 : i32, i32, i32
  }
  func.func @transform_4(%arg0: i32) -> (i32, i32, i32) {
    %c0_i32 = arith.constant 0 : i32
    %c0_i32_0 = arith.constant 0 : i32
    %c0_i32_1 = arith.constant 0 : i32
    %c0_i32_2 = arith.constant 0 : i32
    return %c0_i32, %c0_i32_0, %c0_i32_1 : i32, i32, i32
  }
  func.func @transform_5(%arg0: i32) -> (i32, i32) {
    %c0_i32 = arith.constant 0 : i32
    %c0_i32_0 = arith.constant 0 : i32
    %c0_i32_1 = arith.constant 0 : i32
    return %c0_i32, %c0_i32_0 : i32, i32
  }
  func.func @transform_6(%arg0: i32) -> (i32, i32, i32) {
    %c0_i32 = arith.constant 0 : i32
    %c0_i32_0 = arith.constant 0 : i32
    %c0_i32_1 = arith.constant 0 : i32
    %c0_i32_2 = arith.constant 0 : i32
    return %c0_i32, %c0_i32_0, %c0_i32_1 : i32, i32, i32
  }
  func.func @transform_7(%arg0: i32) -> (i32, i32, i32) {
    %c0_i32 = arith.constant 0 : i32
    %c0_i32_0 = arith.constant 0 : i32
    %c0_i32_1 = arith.constant 0 : i32
    return %arg0, %c0_i32, %c0_i32_0 : i32, i32, i32
  }
  func.func @transform_8(%arg0: i32) -> (i32, i32, i32) {
    %c0_i32 = arith.constant 0 : i32
    %c0_i32_0 = arith.constant 0 : i32
    %c0_i32_1 = arith.constant 0 : i32
    return %arg0, %c0_i32, %c0_i32_0 : i32, i32, i32
  }
}

</mosaic_0001>

<bundles_post_ra>
// kernel: tpu_custom_call.1
= control target key start
LH: loop header
LB: loop body
LE: loop exit
PB: predicated region body
PF: predicated region fallthrough
CT: control target
= control target key end

     0   :  { %14 = vsyncpa [#allocation5], 0  ;;  %s4360_s0 = inlined_call_operand.vmem [shape: bf16[2,4,256], index: 0, kind: input, shape index: {}]   ;;  %s4361_s1 = inlined_call_operand.vmem [shape: bf16[2,8,256], index: 1, kind: input, shape index: {}]   ;;  %s4362_s2 = inlined_call_operand.vmem [shape: f32[2,8,256], index: 2, kind: input, shape index: {}]   ;;  %s4363_s3 = inlined_call_operand.vmem [shape: bf16[9,32,4], index: 3, kind: input, shape index: {}]   ;;  %s4364_s4 = inlined_call_operand.vmem [shape: bf16[9,32,8], index: 4, kind: input, shape index: {}]   ;;  %s4365_s5 = inlined_call_operand.vmem [shape: f32[32,1], index: 5, kind: input, shape index: {}]   ;;  %s4366_s6 = inlined_call_operand.vmem [shape: bf16[9,1,256], index: 6, kind: input, shape index: {}]   ;;  %s4367_s7 = inlined_call_operand.hbm [shape: f32[2,8,256], index: 7, kind: output, shape index: {0}]   ;;  %s4368_s8 = inlined_call_operand.hbm [shape: f32[2,8,256], index: 8, kind: output, shape index: {1}]  }
   0x1   :  { %16 = vsyncpa [#allocation5 + $0x1], 0 }
   0x2   :  { %17 = vsyncpa [#allocation7], 0 }
   0x3   :  { %19 = vsyncpa [#allocation7 + $0x1], 0  ;;  %s3610_s27 = smov 0   ;;  %s3612_s28 = smov 0  }
   0x4   :  { %s3614_s29 = smov 0   ;;  %s3616_s30 = smov 0  }
   0x5 LB: > { %s3631_s9 = sadd.s32 4294967295, %s3550_s30   ;;  %s3116_s10 = sadd.s32 4294967294, %s3550_s30   ;;  %s3550_s30 = sphi %s3616_s30, %s4392_s30   ;;  %s3546_s29 = sphi %s3614_s29, %s4391_s29   ;;  %s3542_s28 = sphi %s3612_s28, %s4390_s28   ;;  %s3538_s27 = sphi %s3610_s27, %s4389_s27  }
   0x6   : > { %s3635_s11 = sadd.s32 1, %s3550_s30   ;;  %s194_s12 = sadd.s32 1, %s3546_s29 }
   0x7   : > { %s191_s13 = ssub.s32 %s3550_s30, %s3635_s11  ;;  %p204_p0 = scmp.ne.s32.totalorder %s3546_s29, %s3542_s28 }
   0x8   : > { %p192_p1 = scmp.eq.s32.totalorder %s191_s13, 0  ;;  %p205_p2 = scmp.eq.s32.totalorder %s3631_s9, 1 }
   0x9   : > { %p210_p3 = scmp.ne.s32.totalorder %s3542_s28, %s3538_s27  ;;  %p211_p4 = scmp.eq.s32.totalorder %s3116_s10, 1 }
   0xa   : > { %s3646_s14 = scalar_select %p192_p1, %s3546_s29, %s194_s12  }
   0xb   : > { %p3648_p5 = por %p205_p2, %p204_p0  ;;  %p3652_p6 = por %p211_p4, %p210_p3 }
   0xc   : > { %p3119_p7 = scmp.ge.s32.totalorder %s3550_s30, 1  ;;  %p291_p8 = scmp.lt.s32.totalorder %s3550_s30, 3 }
   0xe   : > { %p292_p9 = pnand %p3119_p7, %p291_p8 }
  0x10   : > { %295 = sbr.rel (%p292_p9) target bundleno = 743 (0x2e7), region = 48 }
  0x15   : > { %v3128_v0 = vld.sshfl [vmem:[%s4366_s6] sm:$0x11 pattern:$0x75316420]  ;;  %v382_v1 = vlaneseq  ;;  %v3552_v2 = vmov 1966171168  }
  0x16   : > { %v380_v3 = vunpack.c.l.s4 %v3552_v2  ;;  %v3553_v5 = vmov 1983009808   ;;  %v3144_v7 = vld.sshfl [vmem:[%s4366_s6 + $0x2] sm:$0x11 pattern:$0x75316420]  ;;  %v378_v8 = vcombine.high %v3128_v0, %v3128_v0 }
  0x17   : > { %v383_v4 = vshrl.u32 %v382_v1, 7  ;;  %v411_v6 = vunpack.c.l.s4 %v3553_v5  ;;  %v652_v10 = vcombine.high %v3144_v7, %v3144_v7  ;;  %v3168_v11 = vld.sshfl [vmem:[%s4366_s6 + $0x4] sm:$0x11 pattern:$0x75316420]  ;;  %p340_p10 = scmp.lt.s32.totalorder %s3631_s9, 1 }
  0x18   : > { %v381_v9 = vunpack.c.0.s8 %v380_v3  ;;  %v940_v12 = vcombine.high %v3168_v11, %v3168_v11  ;;  %v3192_v13 = vld.sshfl [vmem:[%s4366_s6 + $0x6] sm:$0x11 pattern:$0x75316420]  ;;  %v3554_v17 = vmov 0   ;;  %s3555_s21 = smov 111  }
  0x19   : > { %v3673_v15 = vsub.s32 0, %v383_v4  ;;  %v1228_v16 = vcombine.high %v3192_v13, %v3192_v13  ;;  %s3676_s25 = scalar_select %p340_p10, %s3631_s9, 1  ;;  %356 = vst [vmem:[#allocation2] sm:$0x3] %v3554_v17  ;;  %357 = vst [vmem:[#allocation2 + $0x6] sm:$0x3] %v3554_v17  ;;  %518 = vmatprep.mubr.bf16.mxu0 %v3554_v17  ;;  %620 = vmatprep.mubr.bf16.mxu1 %v3554_v17  ;;  %v412_v18 = vunpack.c.0.s8 %v411_v6 }
  0x1a   : > { %v3671_v14 = vsub.s32 %v381_v9, %v383_v4  ;;  %358 = vst [vmem:[#allocation3] sm:$0xf] %v3554_v17  ;;  %359 = vst [vmem:[#allocation3 + $0xc] sm:$0xf] %v3554_v17  ;;  %3402 = vset.pattern.permute.xlu0 %v3554_v17  ;;  %3403 = vset.pattern.permute.xlu1 %v3554_v17  ;;  %s3556_s22 = smov 112   ;;  %s3557_s23 = smov 113  }
  0x1b   : > { %s3342_s26 = sshll.u32 %s3676_s25, 2  ;;  %s3343_s10 = sshll.u32 %s3676_s25, 3  ;;  %v3704_v33 = vsub.s32 %v412_v18, %v383_v4  ;;  %v3239_v54 = vld.sshfl [vmem:[%s4366_s6 + $0xa] sm:$0x11 pattern:$0x75316420] }
  0x1c   : > { %v385_v19 = vrot.slane %v3128_v0, %v3671_v14  ;;  %v392_v20 = vrot.slane %v378_v8, %v3671_v14  ;;  %v659_v21 = vrot.slane %v3144_v7, %v3671_v14  ;;  %v666_v22 = vrot.slane %v652_v10, %v3671_v14  ;;  %s344_s17 = scalar_lea.vmem %s4360_s0, %s3342_s26  ;;  %s349_s20 = scalar_lea.vmem %s4361_s1, %s3343_s10  ;;  %v3263_v18 = vld.sshfl [vmem:[%s4366_s6 + $0xc] sm:$0x11 pattern:$0x75316420] }
  0x1d   : > { %v947_v23 = vrot.slane %v3168_v11, %v3671_v14  ;;  %v954_v24 = vrot.slane %v940_v12, %v3671_v14  ;;  %v1235_v25 = vrot.slane %v3192_v13, %v3671_v14  ;;  %v1242_v26 = vrot.slane %v1228_v16, %v3671_v14  ;;  %v364_v31 = vld [vmem:[%s344_s17] sm:$0xf]  ;;  %s3558_s24 = smov 127   ;;  %s3559_s12 = smov 17  }
  0x1e   : > { %v394_v27 = vpack.i.b16 %v385_v19, %v385_v19  ;;  %v401_v28 = vpack.i.b16 %v392_v20, %v392_v20  ;;  %v668_v29 = vpack.i.b16 %v659_v21, %v659_v21  ;;  %v675_v30 = vpack.i.b16 %v666_v22, %v666_v22  ;;  %v3702_v32 = vld [vmem:[%s349_s20] sm:$0xff]  ;;  %365 = vst [vmem:[#allocation2 + $0x2] sm:$0xf] %v364_v31  ;;  %s3560_s18 = smov 1   ;;  %s3561_s19 = smov 16  }
  0x1f   : > { %v956_v34 = vpack.i.b16 %v947_v23, %v947_v23  ;;  %v963_v35 = vpack.i.b16 %v954_v24, %v954_v24  ;;  %367 = vst [vmem:[#allocation3 + $0x4] sm:$0xff] %v3702_v32  ;;  %v1244_v40 = vpack.i.b16 %v1235_v25, %v1235_v25  ;;  %v1251_v41 = vpack.i.b16 %v1242_v26, %v1242_v26  ;;  %s3562_s10 = smov 15   ;;  %s3344_s13 = sshll.u32 %s3676_s25, 4 }
  0x20   : > { %v399_v36 = vrot.slane %v394_v27, %v3673_v15  ;;  %v406_v37 = vrot.slane %v401_v28, %v3673_v15  ;;  %v673_v38 = vrot.slane %v668_v29, %v3673_v15  ;;  %v680_v39 = vrot.slane %v675_v30, %v3673_v15  ;;  %s3563_s17 = smov [#allocation6]  }
  0x21   : > { %v961_v44 = vrot.slane %v956_v34, %v3673_v15  ;;  %v968_v45 = vrot.slane %v963_v35, %v3673_v15  ;;  %v1249_v49 = vrot.slane %v1244_v40, %v3673_v15  ;;  %v1256_v50 = vrot.slane %v1251_v41, %v3673_v15 }
  0x22   : > { %v409_v42 = vcombine.low %v399_v36, %v406_v37  ;;  %v683_v43 = vcombine.low %v673_v38, %v680_v39  ;;  %v1764_v55 = vcombine.high %v3239_v54, %v3239_v54  ;;  %vm420_vm0 = vcmask 908288  }
  0x23   : > { %v971_v48 = vcombine.low %v961_v44, %v968_v45  ;;  %v1259_v52 = vcombine.low %v1249_v49, %v1256_v50  ;;  %v1771_v58 = vrot.slane %v3239_v54, %v3671_v14  ;;  %vm694_vm1 = vcmask 916480  }
  0x24   : > { %v416_v46 = vrot.slane %v409_v42, %v3704_v33  ;;  %v690_v47 = vrot.slane %v683_v43, %v3704_v33  ;;  %v1778_v59 = vrot.slane %v1764_v55, %v3671_v14  ;;  %v2050_v26 = vcombine.high %v3263_v18, %v3263_v18 }
  0x25   : > { %v978_v51 = vrot.slane %v971_v48, %v3704_v33  ;;  %v1266_v53 = vrot.slane %v1259_v52, %v3704_v33  ;;  %v369_v1 = vld [vmem:[#allocation2] sm:$0x3f]  ;;  %v1780_v5 = vpack.i.b16 %v1771_v58, %v1771_v58  ;;  %v2057_v34 = vrot.slane %v3263_v18, %v3671_v14 }
  0x26   : > { %417 = vrot.lane.b32.xlu0 %v416_v46, %s3555_s21  ;;  %691 = vrot.lane.b32.xlu1 %v690_v47, %s3556_s22  ;;  %v425_v61 = vld [vmem:[#allocation3 + $0x8] sm:$0xf]  ;;  %v3732_v63 = vld [vmem:[#allocation3] sm:$0xff]  ;;  %v1787_v6 = vpack.i.b16 %v1778_v59, %v1778_v59  ;;  %v643_v20 = vld [vmem:[#allocation2] sm:$0x3f]  ;;  %v2064_v35 = vrot.slane %v2050_v26, %v3671_v14  ;;  %vm982_vm2 = vcmask 924672  }
  0x27   : > { %v1785_v13 = vrot.slane %v1780_v5, %v3673_v15  ;;  %v2066_v39 = vpack.i.b16 %v2057_v34, %v2057_v34  ;;  %v699_v45 = vld [vmem:[#allocation3 + $0x8] sm:$0xf]  ;;  %v931_v50 = vld [vmem:[#allocation2] sm:$0x3f]  ;;  %vm1270_vm3 = vcmask 1039360   ;;  %vm469_vm4 = vcmask 138240  }
  0x28   : > { %v1792_v16 = vrot.slane %v1787_v6, %v3673_v15  ;;  %v2073_v40 = vpack.i.b16 %v2064_v35, %v2064_v35  ;;  %v1219_v18 = vld [vmem:[#allocation2] sm:$0x3f]  ;;  %vm479_vm5 = vcmask 1043456   ;;  %vm581_vm6 = vcmask 1041408  }
  0x29   : > { %v2071_v46 = vrot.slane %v2066_v39, %v3673_v15  ;;  %vm472_vm7 = vcmask 64512   ;;  %vm1325_vm8 = vcmask 7168   ;;  %vm574_vm9 = vcmask 31744  }
  0x2a   : > { %429 = vrot.lane.b32.xlu0 %v409_v42, %s3555_s21  ;;  %703 = vrot.lane.b32.xlu1 %v683_v43, %s3556_s22  ;;  %v1795_v25 = vcombine.low %v1785_v13, %v1792_v16  ;;  %v2078_v47 = vrot.slane %v2073_v40, %v3673_v15  ;;  %v3311_v13 = vld.sshfl [vmem:[%s4366_s6 + $0x10] sm:$0x11 pattern:$0x75316420]  ;;  %vm749_vm10 = vcmask 130048   ;;  %vm1037_vm11 = vcmask 121856  }
  0x2b   : > { %v1275_v40 = vld [vmem:[#allocation3 + $0x8] sm:$0xf] }
  0x2c   : > { %v1802_v31 = vrot.slane %v1795_v25, %v3704_v33  ;;  %v2081_v55 = vcombine.low %v2071_v46, %v2078_v47 }
  0x2e   : > { %979 = vrot.lane.b32.xlu0 %v978_v51, %s3557_s23  ;;  %991 = vrot.lane.b32.xlu1 %v971_v48, %s3557_s23  ;;  %v3287_v48 = vld.sshfl [vmem:[%s4366_s6 + $0xe] sm:$0x11 pattern:$0x75316420] }
  0x32   : > { %1267 = vrot.lane.b32.xlu0 %v1266_v53, %s3558_s24  ;;  %1279 = vrot.lane.b32.xlu1 %v1259_v52, %s3558_s24 }
  0x98   : > { %v418_v56 = vpop.permute.xlu0 %417  ;;  %v692_v62 = vpop.permute.xlu1 %691 }
  0x99   : > { %v419_v57 = vrot.slane %v418_v56, 6  ;;  %v693_v10 = vrot.slane %v692_v62, 6 }
  0x9b   : > { %v421_v2 = vsel %vm420_vm0, %v419_v57, %v418_v56  ;;  %v695_v21 = vsel %vm694_vm1, %v693_v10, %v692_v62  ;;  %v2336_v56 = vcombine.high %v3287_v48, %v3287_v48  ;;  %v2343_v62 = vrot.slane %v3287_v48, %v3671_v14  ;;  %v987_v10 = vld [vmem:[#allocation3 + $0x8] sm:$0xf] }
  0x9c   : > { %v430_v60 = vpop.permute.xlu0 %429  ;;  %v423_v8 = vmul.bf16 %v421_v2, %v369_v1  ;;  %v704_v12 = vpop.permute.xlu1 %703  ;;  %v697_v27 = vmul.bf16 %v695_v21, %v643_v20 }
  0x9d   : > { %v431_v0 = vrot.slane %v430_v60, 4  ;;  %v705_v23 = vrot.slane %v704_v12, 4 }
  0x9e   : > { %v557_v22 = vrot.slane %v423_v8, %v3704_v33  ;;  %v550_v24 = vcombine.high %v423_v8, %v423_v8  ;;  %v734_v37 = vrot.slane %v697_v27, %v3704_v33  ;;  %v727_v43 = vcombine.high %v697_v27, %v697_v27 }
  0x9f   : > { %v432_v3 = vsel %vm420_vm0, %v431_v0, %v430_v60  ;;  %v436_v4 = vmul.bf16 %v431_v0, %v425_v61  ;;  %v706_v29 = vsel %vm694_vm1, %v705_v23, %v704_v12  ;;  %v710_v53 = vmul.bf16 %v705_v23, %v699_v45 }
  0xa0   : > { %v435_v7 = vmul.bf16 %v432_v3, %v3732_v63  ;;  %v565_v28 = vcombine.high %v557_v22, %v557_v22  ;;  %v564_v30 = vrot.slane %v550_v24, %v3704_v33  ;;  %v709_v36 = vmul.bf16 %v706_v29, %v3732_v63  ;;  %v980_v38 = vpop.permute.xlu0 %979  ;;  %v992_v44 = vpop.permute.xlu1 %991 }
  0xa1   : > { %v3134_v9 = vcombine.low %v436_v4, %v436_v4  ;;  %v981_v42 = vrot.slane %v980_v38, 6  ;;  %v742_v49 = vcombine.high %v734_v37, %v734_v37  ;;  %v993_v52 = vrot.slane %v992_v44, 4 }
  0xa2   : > { %v3133_v11 = vcombine.high %v435_v7, %v435_v7  ;;  %v3132_v19 = vcombine.low %v435_v7, %v435_v7  ;;  %v3161_v41 = vcombine.low %v709_v36, %v709_v36  ;;  %v741_v54 = vrot.slane %v727_v43, %v3704_v33 }
  0xa3   : > { %467 = vrot.lane.b32.xlu0 %v3134_v9, %s3559_s12  ;;  %v983_v51 = vsel %vm982_vm2, %v981_v42, %v980_v38  ;;  %v3162_v58 = vcombine.high %v709_v36, %v709_v36  ;;  %v994_v59 = vsel %vm982_vm2, %v993_v52, %v992_v44  ;;  %v3163_v60 = vcombine.low %v710_v53, %v710_v53 }
  0xa4   : > { %465 = vrot.lane.b32.xlu1 %v3133_v11, %s3559_s12  ;;  %v985_v57 = vmul.bf16 %v983_v51, %v931_v50  ;;  %v2088_v61 = vrot.slane %v2081_v55, %v3704_v33  ;;  %v2350_v0 = vrot.slane %v2336_v56, %v3671_v14  ;;  %v997_v1 = vmul.bf16 %v994_v59, %v3732_v63  ;;  %v1268_v3 = vpop.permute.xlu0 %1267  ;;  %v1280_v9 = vpop.permute.xlu1 %1279  ;;  %v3404_v56 = vld [vmem:[%s4364_s4] sm:$0xff]  }
  0xa5   : > { %v2352_v4 = vpack.i.b16 %v2343_v62, %v2343_v62  ;;  %v1269_v7 = vrot.slane %v1268_v3, 6  ;;  %v1281_v20 = vrot.slane %v1280_v9, 4  ;;  %v998_v21 = vmul.bf16 %v993_v52, %v987_v10  ;;  %v3405_v62 = vld [vmem:[%s4363_s3] sm:$0xff]  }
  0xa6   : > { %v1022_v2 = vrot.slane %v985_v57, %v3704_v33  ;;  %v2359_v5 = vpack.i.b16 %v2350_v0, %v2350_v0  ;;  %v3185_v6 = vcombine.low %v997_v1, %v997_v1  ;;  %v1015_v8 = vcombine.high %v985_v57, %v985_v57 }
  0xa7   : > { %463 = vrot.lane.b32.xlu0 %v3132_v19, %s3559_s12  ;;  %v2357_v11 = vrot.slane %v2352_v4, %v3673_v15  ;;  %v1271_v19 = vsel %vm1270_vm3, %v1269_v7, %v1268_v3  ;;  %v2622_v24 = vcombine.high %v3311_v13, %v3311_v13  ;;  %v3186_v26 = vcombine.high %v997_v1, %v997_v1  ;;  %v1755_v1 = vld [vmem:[#allocation2 + $0x2] sm:$0x3f]  ;;  %v3406_v4 = vld [vmem:[%s4364_s4 + $0x8] sm:$0xff]  }
  0xa8   : > { %566 = vrot.lane.b32.xlu1 %v557_v22, %s3559_s12  ;;  %v2364_v12 = vrot.slane %v2359_v5, %v3673_v15  ;;  %v1030_v16 = vcombine.high %v1022_v2, %v1022_v2  ;;  %v1029_v22 = vrot.slane %v1015_v8, %v3704_v33  ;;  %v1282_v27 = vsel %vm1270_vm3, %v1281_v20, %v1280_v9 }
  0xa9   : > { %v1285_v34 = vmul.bf16 %v1282_v27, %v3732_v63  ;;  %v1286_v43 = vmul.bf16 %v1281_v20, %v1275_v40 }
  0xaa   : > { %v2367_v23 = vcombine.low %v2357_v11, %v2364_v12  ;;  %v3216_v12 = vld.sshfl [vmem:[%s4366_s6 + $0x8] sm:$0x11 pattern:$0x75316420] }
  0xab   : > { %568 = vrot.lane.b32.xlu0 %v565_v28, %s3559_s12  ;;  %v3187_v28 = vcombine.low %v998_v21, %v998_v21  ;;  %v3209_v38 = vcombine.low %v1285_v34, %v1285_v34  ;;  %v3210_v46 = vcombine.high %v1285_v34, %v1285_v34  ;;  %v3211_v47 = vcombine.low %v1286_v43, %v1286_v43 }
  0xac   : > { %570 = vrot.lane.b32.xlu1 %v564_v30, %s3559_s12  ;;  %v2374_v29 = vrot.slane %v2367_v23, %v3704_v33  ;;  %v2629_v30 = vrot.slane %v3311_v13, %v3671_v14 }
  0xae   : > { %v2638_v36 = vpack.i.b16 %v2629_v30, %v2629_v30 }
  0xaf   : > { %1803 = vrot.lane.b32.xlu0 %v1802_v31, %s3560_s18  ;;  %v2636_v31 = vrot.slane %v2622_v24, %v3671_v14 }
  0xb0   : > { %743 = vrot.lane.b32.xlu1 %v734_v37, %s3561_s19 }
  0xb1   : > { %v2645_v37 = vpack.i.b16 %v2636_v31, %v2636_v31 }
  0xb3   : > { %1814 = vrot.lane.b32.xlu0 %v1795_v25, %s3560_s18  ;;  %v1273_v25 = vmul.bf16 %v1271_v19, %v1219_v18  ;;  %v2650_v42 = vrot.slane %v2645_v37, %v3673_v15 }
  0xb4   : > { %848 = vrot.lane.b32.xlu1 %v3161_v41, %s3561_s19  ;;  %v2643_v41 = vrot.slane %v2638_v36, %v3673_v15 }
  0xb5   : > { %v1310_v35 = vrot.slane %v1273_v25, %v3704_v33  ;;  %v1303_v39 = vcombine.high %v1273_v25, %v1273_v25 }
  0xb6   : > { %v2653_v45 = vcombine.low %v2643_v41, %v2650_v42  ;;  %v3409_v42 = vld [vmem:[%s4364_s4 + $0x10] sm:$0xff]  }
  0xb7   : > { %745 = vrot.lane.b32.xlu0 %v742_v49, %s3561_s19  ;;  %v1318_v63 = vcombine.high %v1310_v35, %v1310_v35  ;;  %v1317_v44 = vrot.slane %v1303_v39, %v3704_v33 }
  0xb8   : > { %747 = vrot.lane.b32.xlu1 %v741_v54, %s3561_s19  ;;  %v2660_v48 = vrot.slane %v2653_v45, %v3704_v33 }
  0xbb   : > { %850 = vrot.lane.b32.xlu0 %v3162_v58, %s3561_s19 }
  0xbc   : > { %852 = vrot.lane.b32.xlu1 %v3163_v60, %s3561_s19 }
  0xbf   : > { %2089 = vrot.lane.b32.xlu0 %v2088_v61, %s3562_s10 }
  0xc0   : > { %1031 = vrot.lane.b32.xlu1 %v1022_v2, %s3562_s10 }
  0xc3   : > { %2100 = vrot.lane.b32.xlu0 %v2081_v55, %s3562_s10 }
  0xc4   : > { %1136 = vrot.lane.b32.xlu1 %v3185_v6, %s3562_s10 }
  0xc7   : > { %1033 = vrot.lane.b32.xlu0 %v1030_v16, %s3562_s10  ;;  %v3407_v16 = vld [vmem:[%s4363_s3 + $0x8] sm:$0xff]  }
  0xc8   : > { %1035 = vrot.lane.b32.xlu1 %v1029_v22, %s3562_s10  ;;  %v1516_v22 = vcombine.high %v3216_v12, %v3216_v12 }
  0xca   : > { %v1530_v36 = vrot.slane %v1516_v22, %v3671_v14 }
  0xcb   : > { %1138 = vrot.lane.b32.xlu0 %v3186_v26, %s3562_s10 }
  0xcc   : > { %1140 = vrot.lane.b32.xlu1 %v3187_v28, %s3562_s10 }
  0xcf   : > { %2375 = vrot.lane.b32.xlu0 %v2374_v29, %s3561_s19  ;;  %v1523_v29 = vrot.slane %v3216_v12, %v3671_v14 }
  0xd0   : > { %1319 = vrot.lane.b32.xlu1 %v1310_v35, %s3560_s18  ;;  %v3408_v35 = vld [vmem:[%s4363_s3 + $0x10] sm:$0xff]  }
  0xd3   : > { %2386 = vrot.lane.b32.xlu0 %v2367_v23, %s3561_s19  ;;  %v1810_v23 = vld [vmem:[#allocation3 + $0xc] sm:$0xf]  ;;  %s354_s19 = scalar_lea.vmem %s4362_s2, %s3344_s13 }
  0xd4   : > { %1424 = vrot.lane.b32.xlu1 %v3209_v38, %s3560_s18 }
  0xd7   : > { %1321 = vrot.lane.b32.xlu0 %v1318_v63, %s3560_s18  ;;  %v2041_v63 = vld [vmem:[#allocation2 + $0x2] sm:$0x3f] }
  0xd8   : > { %1323 = vrot.lane.b32.xlu1 %v1317_v44, %s3560_s18  ;;  %v1532_v44 = vpack.i.b16 %v1523_v29, %v1523_v29 }
  0xdb   : > { %1426 = vrot.lane.b32.xlu0 %v3210_v46, %s3560_s18 }
  0xdc   : > { %1428 = vrot.lane.b32.xlu1 %v3211_v47, %s3560_s18  ;;  %s4369_s18 = sshll.u32 %s3631_s9, 8 }
  0xdf   : > { %2661 = vrot.lane.b32.xlu0 %v2660_v48, %s3559_s12 }
  0xe0   : > { %2672 = vrot.lane.b32.xlu1 %v2653_v45, %s3559_s12  ;;  %v1539_v45 = vpack.i.b16 %v1530_v36, %v1530_v36 }
 0x115   : > { %v468_v49 = vpop.permute.xlu0 %467 }
 0x116   : > { %v466_v50 = vpop.permute.xlu1 %465 }
 0x117   : > { %v471_v51 = vsel %vm469_vm4, %v466_v50, %v468_v49 }
 0x118   : > { %3135 = vmatprep.subr.msk.bf16.mxu0 %vm479_vm5, %v471_v51 }
 0x119   : > { %v464_v52 = vpop.permute.xlu0 %463 }
 0x11a   : > { %v567_v53 = vpop.permute.xlu1 %566  ;;  %v470_v54 = vsel %vm469_vm4, %v464_v52, %v466_v50  ;;  %v3410_v52 = vld [vmem:[%s4363_s3 + $0x18] sm:$0xff]  }
 0x11b   : > { %v481_v55 = vsel %vm479_vm5, %v470_v54, 0  ;;  %v1544_v54 = vrot.slane %v1539_v45, %v3673_v15 }
 0x11c   : > { %501 = vmatpush1.bf16.msra.mxu0 %v481_v55 }
 0x11d   : > { %v569_v57 = vpop.permute.xlu0 %568 }
 0x11e   : > { %v571_v58 = vpop.permute.xlu1 %570  ;;  %v572_v59 = vsel %vm469_vm4, %v567_v53, %v569_v57  ;;  %v1537_v53 = vrot.slane %v1532_v44, %v3673_v15 }
 0x11f   : > { %v573_v60 = vsel %vm469_vm4, %v569_v57, %v571_v58  ;;  %v583_v61 = vsel %vm581_vm6, %v572_v59, 0  ;;  %3136 = vmatmul.mubr.msk.bf16.vlgmr.msra.gmra.mxu0 %vm472_vm7, %v3404_v56 }
 0x120   : > { %3140 = vmatprep.subr.msk.bf16.mxu1 %vm581_vm6, %v573_v60  ;;  %528 = vmatprep.mubr.bf16.mxu0 %v3554_v17  ;;  %v3890_v15 = vcombine.low %v1537_v53, %v1544_v54 }
 0x121   : > { %v1804_v0 = vpop.permute.xlu0 %1803  ;;  %603 = vmatpush1.bf16.msra.mxu1 %v583_v61 }
 0x122   : > { %v1805_v2 = vrot.slane %v1804_v0, 6  ;;  %v744_v3 = vpop.permute.xlu1 %743 }
 0x124   : > { %v1806_v5 = vsel %vm1325_vm8, %v1805_v2, %v1804_v0  ;;  %3141 = vmatmul.mubr.msk.bf16.vlgmr.msra.gmra.mxu1 %vm574_vm9, %v3405_v62  ;;  %v3411_v62 = vld [vmem:[%s4364_s4 + $0x18] sm:$0xff]   ;;  %v2096_v0 = vld [vmem:[#allocation3 + $0xc] sm:$0xf] }
 0x125   : > { %v1808_v6 = vmul.bf16 %v1806_v5, %v1755_v1  ;;  %v1815_v7 = vpop.permute.xlu0 %1814  ;;  %630 = vmatprep.mubr.bf16.mxu1 %v3554_v17 }
 0x126   : > { %v1816_v8 = vrot.slane %v1815_v7, 4  ;;  %v849_v9 = vpop.permute.xlu1 %848 }
 0x127   : > { %v1838_v10 = vcombine.high %v1808_v6, %v1808_v6  ;;  %v1845_v11 = vrot.slane %v1808_v6, %v3704_v33  ;;  %3137 = vmatmul.mubr.msk.bf16.gmra.mxu0 %vm472_vm7, %v3406_v4 }
 0x128   : > { %v1817_v13 = vsel %vm1325_vm8, %v1816_v8, %v1815_v7  ;;  %796 = vmatprep.mubr.bf16.mxu0 %v3554_v17  ;;  %v1821_v30 = vmul.bf16 %v1816_v8, %v1810_v23  ;;  %v3413_v23 = vld [vmem:[%s4364_s4 + $0x20] sm:$0xff]  }
 0x129   : > { %v1820_v18 = vmul.bf16 %v1817_v13, %v3702_v32  ;;  %1854 = vrot.lane.b32.xlu0 %v1845_v11, %s3558_s24  ;;  %v746_v19 = vpop.permute.xlu0 %745  ;;  %v1852_v26 = vrot.slane %v1838_v10, %v3704_v33  ;;  %v1853_v40 = vcombine.high %v1845_v11, %v1845_v11  ;;  %v1554_v10 = vrot.slane %v3890_v15, %v3704_v33 }
 0x12a   : > { %v750_v20 = vsel %vm749_vm10, %v744_v3, %v746_v19  ;;  %v748_v21 = vpop.permute.xlu1 %747  ;;  %v3258_v46 = vcombine.low %v1821_v30, %v1821_v30 }
 0x12b   : > { %v759_v24 = vsel %vm581_vm6, %v750_v20, 0  ;;  %v751_v25 = vsel %vm749_vm10, %v746_v19, %v748_v21  ;;  %v3256_v27 = vcombine.low %v1820_v18, %v1820_v18  ;;  %v3257_v39 = vcombine.high %v1820_v18, %v1820_v18  ;;  %v1507_v18 = vld [vmem:[#allocation2 + $0x2] sm:$0xf] }
 0x12c   : > { %3152 = vmatprep.subr.msk.bf16.mxu0 %vm581_vm6, %v751_v25  ;;  %3142 = vmatmul.mubr.msk.bf16.gmra.mxu1 %vm574_vm9, %v3407_v16  ;;  %v2327_v20 = vld [vmem:[#allocation2 + $0x2] sm:$0x3f] }
 0x12d   : > { %1858 = vrot.lane.b32.xlu0 %v1852_v26, %s3558_s24  ;;  %v851_v28 = vpop.permute.xlu0 %850  ;;  %1958 = vrot.lane.b32.xlu1 %v3256_v27, %s3558_s24 }
 0x12e   : > { %v854_v31 = vsel %vm749_vm10, %v849_v9, %v851_v28  ;;  %779 = vmatpush1.bf16.msra.mxu0 %v759_v24  ;;  %v853_v34 = vpop.permute.xlu1 %852  ;;  %900 = vmatprep.mubr.bf16.mxu1 %v3554_v17  ;;  %v3412_v9 = vld [vmem:[%s4363_s3 + $0x20] sm:$0xff]   ;;  %v1556_v24 = vmul.bf16 %v1554_v10, %v1507_v18 }
 0x12f   : > { %v863_v37 = vsel %vm479_vm5, %v854_v31, 0  ;;  %v855_v38 = vsel %vm749_vm10, %v851_v28, %v853_v34  ;;  %v3414_v31 = vld [vmem:[%s4363_s3 + $0x28] sm:$0xff]  }
 0x130   : > { %3164 = vmatprep.subr.msk.bf16.mxu1 %vm479_vm5, %v855_v38  ;;  %v1585_v34 = vrot.slane %v1556_v24, %v3704_v33  ;;  %v360_v24 = vld [vmem:[%s4365_s5] sm:$0xff] }
 0x131   : > { %1960 = vrot.lane.b32.xlu0 %v3257_v39, %s3558_s24  ;;  %v2090_v41 = vpop.permute.xlu0 %2089  ;;  %1856 = vrot.lane.b32.xlu1 %v1853_v40, %s3558_s24 }
 0x132   : > { %v2091_v14 = vrot.slane %v2090_v41, 6  ;;  %883 = vmatpush1.bf16.msra.mxu1 %v863_v37  ;;  %v1032_v43 = vpop.permute.xlu1 %1031  ;;  %3153 = vmatmul.mubr.msk.bf16.vlgmr.msra.gmra.mxu0 %vm574_vm9, %v3408_v35 }
 0x133   : > { %806 = vmatprep.mubr.bf16.mxu0 %v3554_v17 }
 0x134   : > { %v2092_v47 = vsel %vm1037_vm11, %v2091_v14, %v2090_v41  ;;  %v2382_v14 = vld [vmem:[#allocation3 + $0xc] sm:$0xf] }
 0x135   : > { %v2094_v48 = vmul.bf16 %v2092_v47, %v2041_v63  ;;  %v2101_v49 = vpop.permute.xlu0 %2100  ;;  %1962 = vrot.lane.b32.xlu1 %v3258_v46, %s3558_s24  ;;  %3165 = vmatmul.mubr.msk.bf16.vlgmr.msra.gmra.mxu1 %vm472_vm7, %v3409_v42  ;;  %v3415_v42 = vld [vmem:[%s4364_s4 + $0x28] sm:$0xff]   ;;  %v1586_v63 = vcombine.high %v1585_v34, %v1585_v34  ;;  %v1562_v47 = vmul.bf16 %v3890_v15, %v3702_v32  ;;  %s3464_s24 = sshll.u32 %s3563_s17, 4  ;;  %s3465_s24 = int_to_ptr.vmem [resolvable:$false] %s3464_s24 }
 0x136   : > { %v2102_v50 = vrot.slane %v2101_v49, 4  ;;  %v1137_v51 = vpop.permute.xlu1 %1136  ;;  %910 = vmatprep.mubr.bf16.mxu1 %v3554_v17 }
 0x137   : > { %v2124_v55 = vcombine.high %v2094_v48, %v2094_v48  ;;  %v2131_v56 = vrot.slane %v2094_v48, %v3704_v33 }
 0x138   : > { %v2103_v57 = vsel %vm1037_vm11, %v2102_v50, %v2101_v49  ;;  %v2107_v6 = vmul.bf16 %v2102_v50, %v2096_v0  ;;  %v3417_v0 = vld [vmem:[%s4364_s4 + $0x30] sm:$0xff]  }
 0x139   : > { %v2106_v58 = vmul.bf16 %v2103_v57, %v3702_v32  ;;  %2140 = vrot.lane.b32.xlu0 %v2131_v56, %s3557_s23  ;;  %v1034_v59 = vpop.permute.xlu0 %1033  ;;  %v2138_v3 = vrot.slane %v2124_v55, %v3704_v33  ;;  %v2139_v16 = vcombine.high %v2131_v56, %v2131_v56  ;;  %v1594_v57 = vsel %vm581_vm6, %v1585_v34, 0 }
 0x13a   : > { %v1038_v60 = vsel %vm1037_vm11, %v1032_v43, %v1034_v59  ;;  %v1036_v61 = vpop.permute.xlu1 %1035  ;;  %3154 = vmatmul.mubr.msk.bf16.gmra.mxu0 %vm574_vm9, %v3410_v52  ;;  %v3282_v25 = vcombine.low %v2107_v6, %v2107_v6  ;;  %v3416_v52 = vld [vmem:[%s4363_s3 + $0x30] sm:$0xff]  }
 0x13b   : > { %v1047_v1 = vsel %vm581_vm6, %v1038_v60, 0  ;;  %v1039_v2 = vsel %vm1037_vm11, %v1034_v59, %v1036_v61  ;;  %v3280_v4 = vcombine.low %v2106_v58, %v2106_v58  ;;  %1084 = vmatprep.mubr.bf16.mxu0 %v3554_v17  ;;  %v3281_v13 = vcombine.high %v2106_v58, %v2106_v58  ;;  %v2613_v61 = vld [vmem:[#allocation2 + $0x2] sm:$0x3f] }
 0x13c   : > { %3176 = vmatprep.subr.msk.bf16.mxu0 %vm581_vm6, %v1039_v2  ;;  %v3234_v58 = vcombine.high %v1562_v47, %v1562_v47  ;;  %v3233_v59 = vcombine.low %v1562_v47, %v1562_v47 }
 0x13d   : > { %2144 = vrot.lane.b32.xlu0 %v2138_v3, %s3557_s23  ;;  %v1139_v5 = vpop.permute.xlu0 %1138  ;;  %2244 = vrot.lane.b32.xlu1 %v3280_v4, %s3557_s23 }
 0x13e   : > { %v1142_v7 = vsel %vm1037_vm11, %v1137_v51, %v1139_v5  ;;  %1067 = vmatpush1.bf16.msra.mxu0 %v1047_v1  ;;  %v1141_v8 = vpop.permute.xlu1 %1140  ;;  %3166 = vmatmul.mubr.msk.bf16.gmra.mxu1 %vm472_vm7, %v3411_v62  ;;  %v1687_v4 = vsel %vm479_vm5, %v3233_v59, 0  ;;  %v3430_v59 = vld [vmem:[%s4363_s3 + $0x68] sm:$0xff]  }
 0x13f   : > { %v1151_v11 = vsel %vm479_vm5, %v1142_v7, 0  ;;  %v1143_v12 = vsel %vm1037_vm11, %v1139_v5, %v1141_v8  ;;  %1188 = vmatprep.mubr.bf16.mxu1 %v3554_v17  ;;  %v3418_v8 = vld [vmem:[%s4363_s3 + $0x38] sm:$0xff]  }
 0x140   : > { %3188 = vmatprep.subr.msk.bf16.mxu1 %vm479_vm5, %v1143_v12  ;;  %v2668_v12 = vld [vmem:[#allocation3 + $0xc] sm:$0xf] }
 0x141   : > { %2246 = vrot.lane.b32.xlu0 %v3281_v13, %s3557_s23  ;;  %v2376_v19 = vpop.permute.xlu0 %2375  ;;  %2142 = vrot.lane.b32.xlu1 %v2139_v16, %s3557_s23  ;;  %v3419_v16 = vld [vmem:[%s4364_s4 + $0x38] sm:$0xff]  }
 0x142   : > { %v2377_v21 = vrot.slane %v2376_v19, 6  ;;  %1171 = vmatpush1.bf16.msra.mxu1 %v1151_v11  ;;  %v1320_v22 = vpop.permute.xlu1 %1319  ;;  %3177 = vmatmul.mubr.msk.bf16.vlgmr.msra.gmra.mxu0 %vm574_vm9, %v3412_v9 }
 0x143   : > { %1094 = vmatprep.mubr.bf16.mxu0 %v3554_v17 }
 0x144   : > { %v2378_v26 = vsel %vm749_vm10, %v2377_v21, %v2376_v19  ;;  %v3421_v21 = vld [vmem:[%s4364_s4 + $0x40] sm:$0xff]  }
 0x145   : > { %v2380_v27 = vmul.bf16 %v2378_v26, %v2327_v20  ;;  %v2387_v28 = vpop.permute.xlu0 %2386  ;;  %2248 = vrot.lane.b32.xlu1 %v3282_v25, %s3557_s23  ;;  %v361_v26 = vld [vmem:[%s4365_s5 + $0x8] sm:$0xff]  ;;  %s4278_s23 = sand.u32 1, %s3542_s28  }
 0x146   : > { %v2388_v29 = vrot.slane %v2387_v28, 4  ;;  %v1425_v30 = vpop.permute.xlu1 %1424  ;;  %3189 = vmatmul.mubr.msk.bf16.vlgmr.msra.gmra.mxu1 %vm472_vm7, %v3413_v23  ;;  %v3423_v23 = vld [vmem:[%s4364_s4 + $0x48] sm:$0xff]   ;;  %s4370_s25 = sshll.u32 %s4278_s23, 4  ;;  %s2973_s10 = scalar_lea.sflag [#allocation7], %s4278_s23 }
 0x147   : > { %v2410_v35 = vcombine.high %v2380_v27, %v2380_v27  ;;  %v2417_v36 = vrot.slane %v2380_v27, %v3704_v33  ;;  %1198 = vmatprep.mubr.bf16.mxu1 %v3554_v17  ;;  %s339_s12 = scalar_lea.vmem [#allocation6], %s4370_s25 }
 0x148   : > { %v2389_v37 = vsel %vm749_vm10, %v2388_v29, %v2387_v28  ;;  %v2393_v49 = vmul.bf16 %v2388_v29, %v2382_v14  ;;  %v362_v29 = vld [vmem:[%s4365_s5 + $0x10] sm:$0xff] }
 0x149   : > { %v2392_v38 = vmul.bf16 %v2389_v37, %v3702_v32  ;;  %2426 = vrot.lane.b32.xlu0 %v2417_v36, %s3556_s22  ;;  %v1322_v39 = vpop.permute.xlu0 %1321  ;;  %v2424_v45 = vrot.slane %v2410_v35, %v3704_v33  ;;  %v2425_v56 = vcombine.high %v2417_v36, %v2417_v36  ;;  %v3424_v37 = vld [vmem:[%s4363_s3 + $0x50] sm:$0xff]  }
 0x14a   : > { %v1326_v40 = vsel %vm1325_vm8, %v1320_v22, %v1322_v39  ;;  %v1324_v41 = vpop.permute.xlu1 %1323  ;;  %3178 = vmatmul.mubr.msk.bf16.gmra.mxu0 %vm574_vm9, %v3414_v31  ;;  %v3306_v2 = vcombine.low %v2393_v49, %v2393_v49  ;;  %v3422_v22 = vld [vmem:[%s4363_s3 + $0x48] sm:$0xff]  }
 0x14b   : > { %v1335_v43 = vsel %vm581_vm6, %v1326_v40, 0  ;;  %v1327_v44 = vsel %vm1325_vm8, %v1322_v39, %v1324_v41  ;;  %v3304_v46 = vcombine.low %v2392_v38, %v2392_v38  ;;  %1372 = vmatprep.mubr.bf16.mxu0 %v3554_v17  ;;  %v3305_v55 = vcombine.high %v2392_v38, %v2392_v38  ;;  %v363_v38 = vld [vmem:[%s4365_s5 + $0x18] sm:$0xff] }
 0x14c   : > { %3200 = vmatprep.subr.msk.bf16.mxu0 %vm581_vm6, %v1327_v44 }
 0x14d   : > { %2430 = vrot.lane.b32.xlu0 %v2424_v45, %s3556_s22  ;;  %v1427_v48 = vpop.permute.xlu0 %1426  ;;  %2530 = vrot.lane.b32.xlu1 %v3304_v46, %s3556_s22  ;;  %v3427_v46 = vld [vmem:[%s4364_s4 + $0x58] sm:$0xff]  }
 0x14e   : > { %v1430_v50 = vsel %vm1325_vm8, %v1425_v30, %v1427_v48  ;;  %1355 = vmatpush1.bf16.msra.mxu0 %v1335_v43  ;;  %v1429_v51 = vpop.permute.xlu1 %1428  ;;  %3190 = vmatmul.mubr.msk.bf16.gmra.mxu1 %vm472_vm7, %v3415_v42  ;;  %v3426_v43 = vld [vmem:[%s4363_s3 + $0x58] sm:$0xff]  }
 0x14f   : > { %v1439_v53 = vsel %vm479_vm5, %v1430_v50, 0  ;;  %v1431_v54 = vsel %vm1325_vm8, %v1427_v48, %v1429_v51  ;;  %1476 = vmatprep.mubr.bf16.mxu1 %v3554_v17  ;;  %3224 = vmatprep.subr.msk.bf16.mxu0 %vm581_vm6, %v1586_v63  ;;  %v3425_v63 = vld [vmem:[%s4364_s4 + $0x50] sm:$0xff]  }
 0x150   : > { %3212 = vmatprep.subr.msk.bf16.mxu1 %vm479_vm5, %v1431_v54 }
 0x151   : > { %2532 = vrot.lane.b32.xlu0 %v3305_v55, %s3556_s22  ;;  %v2662_v60 = vpop.permute.xlu0 %2661  ;;  %2428 = vrot.lane.b32.xlu1 %v2425_v56, %s3556_s22 }
 0x152   : > { %v2663_v62 = vrot.slane %v2662_v60, 6  ;;  %1459 = vmatpush1.bf16.msra.mxu1 %v1439_v53  ;;  %v2673_v15 = vpop.permute.xlu1 %2672  ;;  %3201 = vmatmul.mubr.msk.bf16.vlgmr.msra.gmra.mxu0 %vm574_vm9, %v3416_v52  ;;  %v3428_v52 = vld [vmem:[%s4363_s3 + $0x60] sm:$0xff]  }
 0x153   : > { %v2674_v1 = vrot.slane %v2673_v15, 4  ;;  %1382 = vmatprep.mubr.bf16.mxu0 %v3554_v17  ;;  %1614 = vmatpush1.bf16.msra.mxu0 %v1594_v57  ;;  %v3429_v57 = vld [vmem:[%s4364_s4 + $0x60] sm:$0xff]  }
 0x154   : > { %v2664_v3 = vsel %vm469_vm4, %v2663_v62, %v2662_v60  ;;  %3235 = vmatprep.subr.msk.bf16.mxu1 %vm479_vm5, %v3234_v58  ;;  %v3431_v62 = vld [vmem:[%s4364_s4 + $0x68] sm:$0xff]  }
 0x155   : > { %v2666_v5 = vmul.bf16 %v2664_v3, %v2613_v61  ;;  %v2675_v6 = vsel %vm469_vm4, %v2674_v1, %v2673_v15  ;;  %2534 = vrot.lane.b32.xlu1 %v3306_v2, %s3556_s22  ;;  %v2679_v18 = vmul.bf16 %v2674_v1, %v2668_v12  ;;  %v3434_v12 = vld [vmem:[%s4363_s3 + $0x78] sm:$0xff]   ;;  %s4292_s22 = scalar_lea.hbm %s4368_s8, %s4369_s18 }
 0x156   : > { %v2678_v7 = vmul.bf16 %v2675_v6, %v3702_v32  ;;  %3213 = vmatmul.mubr.msk.bf16.vlgmr.msra.gmra.mxu1 %vm472_vm7, %v3417_v0 }
 0x157   : > { %v2696_v9 = vcombine.high %v2666_v5, %v2666_v5  ;;  %v2703_v10 = vrot.slane %v2666_v5, %v3704_v33  ;;  %1486 = vmatprep.mubr.bf16.mxu1 %v3554_v17  ;;  %1707 = vmatpush1.bf16.msra.mxu1 %v1687_v4  ;;  %v3330_v20 = vcombine.low %v2679_v18, %v2679_v18  ;;  %v3432_v4 = vld [vmem:[%s4363_s3 + $0x70] sm:$0xff]  }
 0x158   : > { %v3328_v11 = vcombine.low %v2678_v7, %v2678_v7  ;;  %v3329_v19 = vcombine.high %v2678_v7, %v2678_v7 }
 0x159   : > { %2712 = vrot.lane.b32.xlu0 %v2703_v10, %s3555_s21  ;;  %v2710_v13 = vrot.slane %v2696_v9, %v3704_v33  ;;  %v2711_v32 = vcombine.high %v2703_v10, %v2703_v10  ;;  %v3420_v33 = vld [vmem:[%s4363_s3 + $0x40] sm:$0xff]   ;;  %v3433_v9 = vld [vmem:[%s4364_s4 + $0x70] sm:$0xff]  }
 0x15a   : > { %2816 = vrot.lane.b32.xlu1 %v3328_v11, %s3555_s21  ;;  %3202 = vmatmul.mubr.msk.bf16.gmra.mxu0 %vm574_vm9, %v3418_v8 }
 0x15b   : > { %1631 = vmatprep.mubr.bf16.mxu0 %v3554_v17 }
 0x15d   : > { %2716 = vrot.lane.b32.xlu0 %v2710_v13, %s3555_s21 }
 0x15e   : > { %2714 = vrot.lane.b32.xlu1 %v2711_v32, %s3555_s21  ;;  %3214 = vmatmul.mubr.msk.bf16.gmra.mxu1 %vm472_vm7, %v3419_v16 }
 0x15f   : > { %1724 = vmatprep.mubr.bf16.mxu1 %v3554_v17 }
 0x161   : > { %2818 = vrot.lane.b32.xlu0 %v3329_v19, %s3555_s21 }
 0x162   : > { %2820 = vrot.lane.b32.xlu1 %v3330_v20, %s3555_s21  ;;  %3225 = vmatmul.mubr.msk.bf16.vlgmr.msra.gmra.mxu0 %vm574_vm9, %v3420_v33  ;;  %v3435_v33 = vld [vmem:[%s4364_s4 + $0x78] sm:$0xff]   ;;  %s3001_s21 = sshll.u32 %s339_s12, 4  ;;  %s4294_s21 = int_to_ptr.vmem [resolvable:$true] %s3001_s21 }
 0x163   : > { %1641 = vmatprep.mubr.bf16.mxu0 %v3554_v17  ;;  %s3460_s13 = scalar_lea.vmem %s4294_s21, 256  ;;  %p3467_p0 = scmp.lt.s32.totalorder %s4294_s21, %s3465_s24 }
 0x164   : > { %p3461_p11 = scmp.ne.s32.totalorder %s4294_s21, %s3460_s13 }
 0x165   : > { %2899 = vperm.xlu0 %3402, %v360_v24  }
 0x166   : > { %3236 = vmatmul.mubr.msk.bf16.vlgmr.msra.gmra.mxu1 %vm472_vm7, %v3421_v21  ;;  %2904 = vperm.xlu1 %3403, %v361_v26   ;;  %v3437_v26 = vld [vmem:[%s4364_s4 + $0x80] sm:$0xff]   ;;  %p3462_p12 = pnand %p3461_p11, %p3648_p5 }
 0x167   : > { %1734 = vmatprep.mubr.bf16.mxu1 %v3554_v17 }
 0x168   : > { %p3463_p13 = pneg %p3462_p12 }
 0x169   : > { %2909 = vperm.xlu0 %3402, %v362_v29   ;;  %v3439_v29 = vld [vmem:[%s4364_s4 + $0x88] sm:$0xff]  }
 0x16a   : > { %3226 = vmatmul.mubr.msk.bf16.gmra.mxu0 %vm574_vm9, %v3422_v22  ;;  %2914 = vperm.xlu1 %3403, %v363_v38  }
 0x16b   : > { %1906 = vmatprep.mubr.bf16.mxu0 %v3554_v17 }
 0x16e   : > { %3237 = vmatmul.mubr.msk.bf16.gmra.mxu1 %vm472_vm7, %v3423_v23 }
 0x16f   : > { %2010 = vmatprep.mubr.bf16.mxu1 %v3554_v17 }
 0x19b   : > { %v1855_v25 = vpop.permute.xlu0 %1854 }
 0x19f   : > { %v1859_v27 = vpop.permute.xlu0 %1858  ;;  %v1959_v28 = vpop.permute.xlu1 %1958 }
 0x1a3   : > { %v1961_v30 = vpop.permute.xlu0 %1960  ;;  %v1857_v31 = vpop.permute.xlu1 %1856 }
 0x1a4   : > { %v1860_v34 = vsel %vm1270_vm3, %v1855_v25, %v1857_v31  ;;  %v1861_v35 = vsel %vm1270_vm3, %v1857_v31, %v1859_v27  ;;  %v1964_v39 = vsel %vm1270_vm3, %v1959_v28, %v1961_v30  ;;  %v3436_v25 = vld [vmem:[%s4363_s3 + $0x80] sm:$0xff]   ;;  %v3438_v27 = vld [vmem:[%s4363_s3 + $0x88] sm:$0xff]  }
 0x1a5   : > { %v1869_v36 = vsel %vm581_vm6, %v1860_v34, 0  ;;  %3247 = vmatprep.subr.msk.bf16.mxu0 %vm581_vm6, %v1861_v35  ;;  %v1973_v42 = vsel %vm479_vm5, %v1964_v39, 0 }
 0x1a6   : > { %1889 = vmatpush1.bf16.msra.mxu0 %v1869_v36 }
 0x1a7   : > { %v1963_v40 = vpop.permute.xlu1 %1962 }
 0x1a8   : > { %v1965_v41 = vsel %vm1270_vm3, %v1961_v30, %v1963_v40 }
 0x1a9   : > { %3248 = vmatmul.mubr.msk.bf16.vlgmr.msra.gmra.mxu0 %vm574_vm9, %v3424_v37  ;;  %3259 = vmatprep.subr.msk.bf16.mxu1 %vm479_vm5, %v1965_v41 }
 0x1aa   : > { %1993 = vmatpush1.bf16.msra.mxu1 %v1973_v42  ;;  %1916 = vmatprep.mubr.bf16.mxu0 %v3554_v17 }
 0x1ab   : > { %v2141_v14 = vpop.permute.xlu0 %2140 }
 0x1ad   : > { %3260 = vmatmul.mubr.msk.bf16.vlgmr.msra.gmra.mxu1 %vm472_vm7, %v3425_v63 }
 0x1ae   : > { %2020 = vmatprep.mubr.bf16.mxu1 %v3554_v17 }
 0x1af   : > { %v2145_v44 = vpop.permute.xlu0 %2144  ;;  %v2245_v45 = vpop.permute.xlu1 %2244 }
 0x1b1   : > { %3249 = vmatmul.mubr.msk.bf16.gmra.mxu0 %vm574_vm9, %v3426_v43 }
 0x1b2   : > { %2192 = vmatprep.mubr.bf16.mxu0 %v3554_v17 }
 0x1b3   : > { %v2247_v47 = vpop.permute.xlu0 %2246  ;;  %v2143_v48 = vpop.permute.xlu1 %2142 }
 0x1b4   : > { %v2146_v49 = vsel %vm982_vm2, %v2141_v14, %v2143_v48  ;;  %v2147_v50 = vsel %vm982_vm2, %v2143_v48, %v2145_v44  ;;  %v2250_v53 = vsel %vm982_vm2, %v2245_v45, %v2247_v47 }
 0x1b5   : > { %v2155_v51 = vsel %vm581_vm6, %v2146_v49, 0  ;;  %3261 = vmatmul.mubr.msk.bf16.gmra.mxu1 %vm472_vm7, %v3427_v46  ;;  %3271 = vmatprep.subr.msk.bf16.mxu0 %vm581_vm6, %v2147_v50  ;;  %v2259_v56 = vsel %vm479_vm5, %v2250_v53, 0 }
 0x1b6   : > { %2175 = vmatpush1.bf16.msra.mxu0 %v2155_v51  ;;  %2296 = vmatprep.mubr.bf16.mxu1 %v3554_v17 }
 0x1b7   : > { %v2249_v54 = vpop.permute.xlu1 %2248 }
 0x1b8   : > { %v2251_v55 = vsel %vm982_vm2, %v2247_v47, %v2249_v54 }
 0x1b9   : > { %3272 = vmatmul.mubr.msk.bf16.vlgmr.msra.gmra.mxu0 %vm574_vm9, %v3428_v52  ;;  %3283 = vmatprep.subr.msk.bf16.mxu1 %vm479_vm5, %v2251_v55 }
 0x1ba   : > { %2279 = vmatpush1.bf16.msra.mxu1 %v2259_v56  ;;  %2202 = vmatprep.mubr.bf16.mxu0 %v3554_v17 }
 0x1bb   : > { %v2427_v58 = vpop.permute.xlu0 %2426 }
 0x1bd   : > { %3284 = vmatmul.mubr.msk.bf16.vlgmr.msra.gmra.mxu1 %vm472_vm7, %v3429_v57 }
 0x1be   : > { %2306 = vmatprep.mubr.bf16.mxu1 %v3554_v17 }
 0x1bf   : > { %v2431_v60 = vpop.permute.xlu0 %2430  ;;  %v2531_v61 = vpop.permute.xlu1 %2530 }
 0x1c1   : > { %3273 = vmatmul.mubr.msk.bf16.gmra.mxu0 %vm574_vm9, %v3430_v59 }
 0x1c2   : > { %2478 = vmatprep.mubr.bf16.mxu0 %v3554_v17 }
 0x1c3   : > { %v2533_v15 = vpop.permute.xlu0 %2532  ;;  %v2429_v0 = vpop.permute.xlu1 %2428 }
 0x1c4   : > { %v2432_v1 = vsel %vm694_vm1, %v2427_v58, %v2429_v0  ;;  %v2433_v2 = vsel %vm694_vm1, %v2429_v0, %v2431_v60  ;;  %v2536_v5 = vsel %vm694_vm1, %v2531_v61, %v2533_v15 }
 0x1c5   : > { %v2441_v3 = vsel %vm581_vm6, %v2432_v1, 0  ;;  %3285 = vmatmul.mubr.msk.bf16.gmra.mxu1 %vm472_vm7, %v3431_v62  ;;  %3295 = vmatprep.subr.msk.bf16.mxu0 %vm581_vm6, %v2433_v2  ;;  %v2545_v8 = vsel %vm479_vm5, %v2536_v5, 0 }
 0x1c6   : > { %2461 = vmatpush1.bf16.msra.mxu0 %v2441_v3  ;;  %2582 = vmatprep.mubr.bf16.mxu1 %v3554_v17 }
 0x1c7   : > { %v2535_v6 = vpop.permute.xlu1 %2534 }
 0x1c8   : > { %v2537_v7 = vsel %vm694_vm1, %v2533_v15, %v2535_v6 }
 0x1c9   : > { %3296 = vmatmul.mubr.msk.bf16.vlgmr.msra.gmra.mxu0 %vm574_vm9, %v3432_v4  ;;  %3307 = vmatprep.subr.msk.bf16.mxu1 %vm479_vm5, %v2537_v7 }
 0x1ca   : > { %2565 = vmatpush1.bf16.msra.mxu1 %v2545_v8  ;;  %2488 = vmatprep.mubr.bf16.mxu0 %v3554_v17 }
 0x1cb   : > { %v2713_v10 = vpop.permute.xlu0 %2712 }
 0x1cc   : > { %v2817_v11 = vpop.permute.xlu1 %2816 }
 0x1cd   : > { %3308 = vmatmul.mubr.msk.bf16.vlgmr.msra.gmra.mxu1 %vm472_vm7, %v3433_v9 }
 0x1ce   : > { %2592 = vmatprep.mubr.bf16.mxu1 %v3554_v17 }
 0x1cf   : > { %v2717_v13 = vpop.permute.xlu0 %2716 }
 0x1d0   : > { %v2715_v32 = vpop.permute.xlu1 %2714 }
 0x1d1   : > { %v2718_v16 = vsel %vm420_vm0, %v2713_v10, %v2715_v32  ;;  %v2719_v18 = vsel %vm420_vm0, %v2715_v32, %v2717_v13  ;;  %3297 = vmatmul.mubr.msk.bf16.gmra.mxu0 %vm574_vm9, %v3434_v12 }
 0x1d2   : > { %v2727_v19 = vsel %vm581_vm6, %v2718_v16, 0  ;;  %3319 = vmatprep.subr.msk.bf16.mxu0 %vm581_vm6, %v2719_v18  ;;  %2764 = vmatprep.mubr.bf16.mxu0 %v3554_v17 }
 0x1d3   : > { %v2819_v20 = vpop.permute.xlu0 %2818  ;;  %2747 = vmatpush1.bf16.msra.mxu0 %v2727_v19 }
 0x1d4   : > { %v2822_v21 = vsel %vm420_vm0, %v2817_v11, %v2819_v20  ;;  %v2821_v22 = vpop.permute.xlu1 %2820 }
 0x1d5   : > { %v2831_v23 = vsel %vm479_vm5, %v2822_v21, 0  ;;  %v2823_v24 = vsel %vm420_vm0, %v2819_v20, %v2821_v22  ;;  %3309 = vmatmul.mubr.msk.bf16.gmra.mxu1 %vm472_vm7, %v3435_v33 }
 0x1d6   : > { %3331 = vmatprep.subr.msk.bf16.mxu1 %vm479_vm5, %v2823_v24  ;;  %2868 = vmatprep.mubr.bf16.mxu1 %v3554_v17 }
 0x1d7   : > { %2851 = vmatpush1.bf16.msra.mxu1 %v2831_v23 }
 0x1d9   : > { %3320 = vmatmul.mubr.msk.bf16.vlgmr.msra.gmra.mxu0 %vm574_vm9, %v3436_v25 }
 0x1da   : > { %2774 = vmatprep.mubr.bf16.mxu0 %v3554_v17 }
 0x1dd   : > { %3332 = vmatmul.mubr.msk.bf16.vlgmr.msra.gmra.mxu1 %vm472_vm7, %v3437_v26 }
 0x1de   : > { %2878 = vmatprep.mubr.bf16.mxu1 %v3554_v17 }
 0x1df   : > { %v520_v28 = vpop.f32.mrf.mxu0 }
 0x1e1   : > { %3321 = vmatmul.mubr.msk.bf16.gmra.mxu0 %vm574_vm9, %v3438_v27  ;;  %v522_v30 = vpop.f32.mrf.mxu0 }
 0x1e3   : > { %v524_v31 = vpop.f32.mrf.mxu0 }
 0x1e4   : > { %v622_v34 = vpop.f32.mrf.mxu1 }
 0x1e5   : > { %3333 = vmatmul.mubr.msk.bf16.gmra.mxu1 %vm472_vm7, %v3439_v29  ;;  %v623_v35 = vadd.f32 %v622_v34, %v520_v28  ;;  %v526_v36 = vpop.f32.mrf.mxu0 }
 0x1e6   : > { %v624_v37 = vpop.f32.mrf.mxu1 }
 0x1e7   : > { %v625_v38 = vadd.f32 %v624_v37, %v522_v30  ;;  %v530_v39 = vpop.f32.mrf.mxu0 }
 0x1e8   : > { %v626_v40 = vpop.f32.mrf.mxu1 }
 0x1e9   : > { %v627_v41 = vadd.f32 %v626_v40, %v524_v31  ;;  %v532_v17 = vpop.f32.mrf.mxu0 }
 0x1ea   : > { %v628_v42 = vpop.f32.mrf.mxu1 }
 0x1eb   : > { %v629_v63 = vadd.f32 %v628_v42, %v526_v36  ;;  %v534_v14 = vpop.f32.mrf.mxu0 }
 0x1ec   : > { %v632_v43 = vpop.f32.mrf.mxu1 }
 0x1ed   : > { %v633_v44 = vadd.f32 %v632_v43, %v530_v39  ;;  %v536_v46 = vpop.f32.mrf.mxu0 }
 0x1ee   : > { %v634_v45 = vpop.f32.mrf.mxu1 }
 0x1ef   : > { %v635_v47 = vadd.f32 %v634_v45, %v532_v17 }
 0x1f0   : > { %v636_v48 = vpop.f32.mrf.mxu1 }
 0x1f1   : > { %v637_v49 = vadd.f32 %v636_v48, %v534_v14 }
 0x1f2   : > { %v638_v50 = vpop.f32.mrf.mxu1  ;;  %v798_v51 = vpop.f32.mrf.mxu0 }
 0x1f3   : > { %v639_v52 = vadd.f32 %v638_v50, %v536_v46  ;;  %v817_v53 = vadd.f32 %v798_v51, %v623_v35 }
 0x1f4   : > { %v800_v54 = vpop.f32.mrf.mxu0 }
 0x1f5   : > { %v818_v55 = vadd.f32 %v800_v54, %v625_v38  ;;  %v902_v56 = vpop.f32.mrf.mxu1 }
 0x1f6   : > { %v921_v57 = vadd.f32 %v902_v56, %v817_v53  ;;  %v802_v58 = vpop.f32.mrf.mxu0 }
 0x1f7   : > { %v819_v59 = vadd.f32 %v802_v58, %v627_v41  ;;  %v904_v60 = vpop.f32.mrf.mxu1 }
 0x1f8   : > { %v922_v61 = vadd.f32 %v904_v60, %v818_v55  ;;  %v804_v62 = vpop.f32.mrf.mxu0 }
 0x1f9   : > { %v820_v15 = vadd.f32 %v804_v62, %v629_v63  ;;  %v906_v0 = vpop.f32.mrf.mxu1 }
 0x1fa   : > { %v923_v1 = vadd.f32 %v906_v0, %v819_v59  ;;  %v808_v2 = vpop.f32.mrf.mxu0 }
 0x1fb   : > { %v821_v3 = vadd.f32 %v808_v2, %v633_v44  ;;  %v908_v4 = vpop.f32.mrf.mxu1 }
 0x1fc   : > { %v924_v5 = vadd.f32 %v908_v4, %v820_v15  ;;  %v810_v6 = vpop.f32.mrf.mxu0 }
 0x1fd   : > { %v822_v7 = vadd.f32 %v810_v6, %v635_v47 }
 0x1fe   : > { %v912_v8 = vpop.f32.mrf.mxu1  ;;  %v812_v9 = vpop.f32.mrf.mxu0 }
 0x1ff   : > { %v925_v10 = vadd.f32 %v912_v8, %v821_v3  ;;  %v823_v11 = vadd.f32 %v812_v9, %v637_v49 }
 0x200   : > { %v914_v12 = vpop.f32.mrf.mxu1  ;;  %v814_v13 = vpop.f32.mrf.mxu0 }
 0x201   : > { %v926_v32 = vadd.f32 %v914_v12, %v822_v7  ;;  %v824_v16 = vadd.f32 %v814_v13, %v639_v52 }
 0x202   : > { %v916_v18 = vpop.f32.mrf.mxu1  ;;  %v1086_v33 = vpop.f32.mrf.mxu0 }
 0x203   : > { %v927_v19 = vadd.f32 %v916_v18, %v823_v11  ;;  %v1105_v20 = vadd.f32 %v1086_v33, %v921_v57 }
 0x204   : > { %v918_v21 = vpop.f32.mrf.mxu1  ;;  %v1088_v22 = vpop.f32.mrf.mxu0 }
 0x205   : > { %v928_v23 = vadd.f32 %v918_v21, %v824_v16  ;;  %v1106_v24 = vadd.f32 %v1088_v22, %v922_v61 }
 0x206   : > { %v1190_v25 = vpop.f32.mrf.mxu1  ;;  %v1090_v26 = vpop.f32.mrf.mxu0 }
 0x207   : > { %v1209_v27 = vadd.f32 %v1190_v25, %v1105_v20  ;;  %v1107_v28 = vadd.f32 %v1090_v26, %v923_v1 }
 0x208   : > { %v1192_v29 = vpop.f32.mrf.mxu1  ;;  %v1092_v30 = vpop.f32.mrf.mxu0 }
 0x209   : > { %v1210_v31 = vadd.f32 %v1192_v29, %v1106_v24  ;;  %v1108_v34 = vadd.f32 %v1092_v30, %v924_v5 }
 0x20a   : > { %v1194_v35 = vpop.f32.mrf.mxu1  ;;  %v1096_v36 = vpop.f32.mrf.mxu0 }
 0x20b   : > { %v4129_v37 = vadd.f32 %v1194_v35, %v1107_v28  ;;  %v1109_v38 = vadd.f32 %v1096_v36, %v925_v10 }
 0x20c   : > { %v1196_v39 = vpop.f32.mrf.mxu1  ;;  %v1098_v40 = vpop.f32.mrf.mxu0 }
 0x20d   : > { %v4131_v41 = vadd.f32 %v1196_v39, %v1108_v34  ;;  %v1110_v17 = vadd.f32 %v1098_v40, %v926_v32 }
 0x20e   : > { %v1200_v42 = vpop.f32.mrf.mxu1  ;;  %v1100_v63 = vpop.f32.mrf.mxu0 }
 0x20f   : > { %v1213_v14 = vadd.f32 %v1200_v42, %v1109_v38  ;;  %v1111_v43 = vadd.f32 %v1100_v63, %v927_v19 }
 0x210   : > { %v1202_v44 = vpop.f32.mrf.mxu1  ;;  %v1102_v45 = vpop.f32.mrf.mxu0 }
 0x211   : > { %v1214_v46 = vadd.f32 %v1202_v44, %v1110_v17  ;;  %v1112_v47 = vadd.f32 %v1102_v45, %v928_v23 }
 0x212   : > { %v1204_v48 = vpop.f32.mrf.mxu1  ;;  %v1374_v49 = vpop.f32.mrf.mxu0 }
 0x213   : > { %v4133_v50 = vadd.f32 %v1204_v48, %v1111_v43  ;;  %v1393_v51 = vadd.f32 %v1374_v49, %v1209_v27 }
 0x214   : > { %v1206_v52 = vpop.f32.mrf.mxu1  ;;  %v1376_v53 = vpop.f32.mrf.mxu0 }
 0x215   : > { %v4135_v54 = vadd.f32 %v1206_v52, %v1112_v47  ;;  %v1394_v55 = vadd.f32 %v1376_v53, %v1210_v31 }
 0x216   : > { %v1478_v56 = vpop.f32.mrf.mxu1  ;;  %v4137_v57 = vpop.f32.mrf.mxu0 }
 0x217   : > { %v4139_v58 = vadd.f32 %v1478_v56, %v1393_v51 }
 0x218   : > { %v1480_v59 = vpop.f32.mrf.mxu1  ;;  %v4141_v60 = vpop.f32.mrf.mxu0 }
 0x219   : > { %v4143_v61 = vadd.f32 %v1480_v59, %v1394_v55 }
 0x21a   : > { %v4145_v62 = vpop.f32.mrf.mxu1  ;;  %v1384_v15 = vpop.f32.mrf.mxu0 }
 0x21b   : > { %v1397_v0 = vadd.f32 %v1384_v15, %v1213_v14 }
 0x21c   : > { %v4147_v1 = vpop.f32.mrf.mxu1  ;;  %v1386_v2 = vpop.f32.mrf.mxu0 }
 0x21d   : > { %v1398_v3 = vadd.f32 %v1386_v2, %v1214_v46 }
 0x21e   : > { %v1488_v4 = vpop.f32.mrf.mxu1  ;;  %v4149_v5 = vpop.f32.mrf.mxu0 }
 0x21f   : > { %v1501_v6 = vadd.f32 %v1488_v4, %v1397_v0 }
 0x220   : > { %v1490_v7 = vpop.f32.mrf.mxu1  ;;  %v4151_v8 = vpop.f32.mrf.mxu0 }
 0x221   : > { %v1502_v9 = vadd.f32 %v1490_v7, %v1398_v3  ;;  %v1395_v7 = vadd.f32 %v4137_v57, %v4129_v37  ;;  %v1399_v57 = vadd.f32 %v4149_v5, %v4133_v50 }
 0x222   : > { %v4153_v10 = vpop.f32.mrf.mxu1  ;;  %v1633_v11 = vpop.f32.mrf.mxu0 }
 0x224   : > { %v4155_v12 = vpop.f32.mrf.mxu1  ;;  %v1635_v13 = vpop.f32.mrf.mxu0 }
 0x225   : > { %v1653_v37 = vadd.f32 %v1635_v13, %v4143_v61 }
 0x226   : > { %v1726_v32 = vpop.f32.mrf.mxu1  ;;  %v1637_v16 = vpop.f32.mrf.mxu0 }
 0x228   : > { %v4157_v18 = vpop.f32.mrf.mxu1  ;;  %v4159_v33 = vpop.f32.mrf.mxu0 }
 0x22a   : > { %v4161_v19 = vpop.f32.mrf.mxu1  ;;  %v1643_v20 = vpop.f32.mrf.mxu0 }
 0x22b   : > { %v1656_v21 = vadd.f32 %v1643_v20, %v1501_v6 }
 0x22c   : > { %v4163_v22 = vpop.f32.mrf.mxu1  ;;  %v1645_v23 = vpop.f32.mrf.mxu0 }
 0x22d   : > { %v1657_v24 = vadd.f32 %v1645_v23, %v1502_v9 }
 0x22e   : > { %v1736_v25 = vpop.f32.mrf.mxu1  ;;  %v4169_v29 = vpop.f32.mrf.mxu0 }
 0x22f   : > { %v4165_v26 = vadd.f32 %v1736_v25, %v1656_v21  ;;  %v1396_v21 = vadd.f32 %v4141_v60, %v4131_v41  ;;  %v1499_v25 = vadd.f32 %v4145_v62, %v1395_v7 }
 0x230   : > { %v1738_v27 = vpop.f32.mrf.mxu1  ;;  %v4171_v30 = vpop.f32.mrf.mxu0 }
 0x231   : > { %v4167_v28 = vadd.f32 %v1738_v27, %v1657_v24  ;;  %v1652_v27 = vadd.f32 %v1633_v11, %v4139_v58  ;;  %v1654_v60 = vadd.f32 %v1637_v16, %v1499_v25  ;;  %v1746_v58 = vadd.f32 %v4157_v18, %v1653_v37 }
 0x232   : > { %v4173_v31 = vpop.f32.mrf.mxu1 }
 0x233   : > { %v1745_v41 = vadd.f32 %v1726_v32, %v1652_v27  ;;  %v1747_v50 = vadd.f32 %v4161_v19, %v1654_v60 }
 0x234   : > { %v4175_v35 = vpop.f32.mrf.mxu1 }
 0x269   : > { %v1908_v34 = vpop.f32.mrf.mxu0 }
 0x26b   : > { %v1910_v36 = vpop.f32.mrf.mxu0 }
 0x26c   : > { %v1928_v5 = vadd.f32 %v1910_v36, %v1746_v58 }
 0x26d   : > { %v1912_v38 = vpop.f32.mrf.mxu0  ;;  %v2012_v39 = vpop.f32.mrf.mxu1 }
 0x26e   : > { %v1929_v18 = vadd.f32 %v1912_v38, %v1747_v50 }
 0x26f   : > { %v4177_v40 = vpop.f32.mrf.mxu0  ;;  %v2014_v17 = vpop.f32.mrf.mxu1 }
 0x270   : > { %v2032_v25 = vadd.f32 %v2014_v17, %v1928_v5 }
 0x271   : > { %v4179_v42 = vpop.f32.mrf.mxu0  ;;  %v2016_v63 = vpop.f32.mrf.mxu1 }
 0x272   : > { %v2033_v36 = vadd.f32 %v2016_v63, %v1929_v18 }
 0x273   : > { %v4181_v14 = vpop.f32.mrf.mxu0  ;;  %v4183_v43 = vpop.f32.mrf.mxu1 }
 0x275   : > { %v4185_v44 = vpop.f32.mrf.mxu0  ;;  %v4187_v45 = vpop.f32.mrf.mxu1 }
 0x277   : > { %v4189_v46 = vpop.f32.mrf.mxu0  ;;  %v4191_v47 = vpop.f32.mrf.mxu1 }
 0x279   : > { %v4193_v48 = vpop.f32.mrf.mxu1  ;;  %v2194_v49 = vpop.f32.mrf.mxu0 }
 0x27b   : > { %v4195_v51 = vpop.f32.mrf.mxu1  ;;  %v2196_v52 = vpop.f32.mrf.mxu0 }
 0x27d   : > { %v2198_v53 = vpop.f32.mrf.mxu0  ;;  %v2298_v55 = vpop.f32.mrf.mxu1 }
 0x27e   : > { %v2215_v38 = vadd.f32 %v2198_v53, %v2033_v36 }
 0x27f   : > { %v2200_v56 = vpop.f32.mrf.mxu0  ;;  %v2300_v59 = vpop.f32.mrf.mxu1 }
 0x281   : > { %v4197_v15 = vpop.f32.mrf.mxu0  ;;  %v2302_v0 = vpop.f32.mrf.mxu1 }
 0x282   : > { %4373 = vst [vmem:[#allocation10_spill] sm:$0xff] %v4197_v15  ;;  %v1500_v15 = vadd.f32 %v4147_v1, %v1396_v21  ;;  %v1503_v1 = vadd.f32 %v4153_v10, %v1399_v57 }
 0x283   : > { %v4199_v2 = vpop.f32.mrf.mxu0  ;;  %v4201_v3 = vpop.f32.mrf.mxu1 }
 0x284   : > { %4374 = vst [vmem:[#allocation11_spill] sm:$0xff] %v4199_v2  ;;  %v1655_v11 = vadd.f32 %v4159_v33, %v1500_v15 }
 0x285   : > { %v4203_v4 = vpop.f32.mrf.mxu0  ;;  %v4205_v6 = vpop.f32.mrf.mxu1 }
 0x286   : > { %4375 = vst [vmem:[#allocation12_spill] sm:$0xff] %v4205_v6 }
 0x287   : > { %v4209_v9 = vpop.f32.mrf.mxu0  ;;  %v4211_v20 = vpop.f32.mrf.mxu1 }
 0x288   : > { %4376 = vst [vmem:[#allocation13_spill] sm:$0xff] %v4209_v9  ;;  %4377 = vst [vmem:[#allocation14_spill] sm:$0xff] %v4211_v20 }
 0x289   : > { %v4215_v23 = vpop.f32.mrf.mxu1  ;;  %v2480_v24 = vpop.f32.mrf.mxu0 }
 0x28a   : > { %4378 = vst [vmem:[#allocation15_spill] sm:$0xff] %v4215_v23  ;;  %v1400_v23 = vadd.f32 %v4151_v8, %v4135_v54  ;;  %v1748_v8 = vadd.f32 %v4163_v22, %v1655_v11 }
 0x28b   : > { %v4219_v2 = vpop.f32.mrf.mxu1  ;;  %v2482_v6 = vpop.f32.mrf.mxu0 }
 0x28c   : > { %4379 = vst [vmem:[#allocation16_spill] sm:$0xff] %v4219_v2  ;;  %v1927_v2 = vadd.f32 %v1908_v34, %v1745_v41  ;;  %v1504_v16 = vadd.f32 %v4155_v12, %v1400_v23  ;;  %v1658_v34 = vadd.f32 %v4169_v29, %v1503_v1  ;;  %v1930_v19 = vadd.f32 %v4177_v40, %v1748_v8 }
 0x28d   : > { %v2484_v20 = vpop.f32.mrf.mxu0  ;;  %v2584_v9 = vpop.f32.mrf.mxu1  ;;  %v2319_v40 = vadd.f32 %v2302_v0, %v2215_v38 }
 0x28e   : > { %v2031_v32 = vadd.f32 %v2012_v39, %v1927_v2  ;;  %v2214_v39 = vadd.f32 %v2196_v52, %v2032_v25  ;;  %v1659_v12 = vadd.f32 %v4171_v30, %v1504_v16  ;;  %v2034_v22 = vadd.f32 %v4183_v43, %v1930_v19  ;;  %v4382_v19 = vld [vmem:[#allocation10_spill] sm:$0xff] }
 0x28f   : > { %v2486_v62 = vpop.f32.mrf.mxu0  ;;  %v2586_v7 = vpop.f32.mrf.mxu1  ;;  %v2501_v43 = vadd.f32 %v2484_v20, %v2319_v40  ;;  %v4380_v18 = vld [vmem:[#allocation13_spill] sm:$0xff] }
 0x290   : > { %v2213_v33 = vadd.f32 %v2194_v49, %v2031_v32  ;;  %v2318_v17 = vadd.f32 %v2300_v59, %v2214_v39  ;;  %v1751_v49 = vadd.f32 %v4173_v31, %v1658_v34  ;;  %v2216_v41 = vadd.f32 %v2200_v56, %v2034_v22 }
 0x291   : > { %v4230_v61 = vpop.f32.mrf.mxu0  ;;  %v2588_v13 = vpop.f32.mrf.mxu1 }
 0x292   : > { %v2317_v2 = vadd.f32 %v2298_v55, %v2213_v33  ;;  %v2500_v63 = vadd.f32 %v2482_v6, %v2318_v17  ;;  %v1752_v55 = vadd.f32 %v4175_v35, %v1659_v12  ;;  %v1933_v30 = vadd.f32 %v4185_v44, %v1751_v49  ;;  %v4381_v33 = vld [vmem:[#allocation15_spill] sm:$0xff]  ;;  %v4385_v49 = vld [vmem:[#allocation12_spill] sm:$0xff] }
 0x293   : > { %v4234_v21 = vpop.f32.mrf.mxu0  ;;  %v2590_v54 = vpop.f32.mrf.mxu1  ;;  %v2320_v11 = vadd.f32 %v4201_v3, %v2216_v41  ;;  %v1931_v44 = vadd.f32 %v4179_v42, %v4165_v26  ;;  %v1932_v3 = vadd.f32 %v4181_v14, %v4167_v28  ;;  %v4386_v41 = vld [vmem:[#allocation14_spill] sm:$0xff] }
 0x294   : > { %v2499_v29 = vadd.f32 %v2480_v24, %v2317_v2  ;;  %v2604_v53 = vadd.f32 %v2586_v7, %v2500_v63  ;;  %v2900_v24 = vpop.permute.xlu0 %2899  ;;  %v1934_v31 = vadd.f32 %v4189_v46, %v1752_v55  ;;  %v2037_v1 = vadd.f32 %v4193_v48, %v1933_v30 }
 0x295   : > { %v4238_v10 = vpop.f32.mrf.mxu0  ;;  %v4240_v15 = vpop.f32.mrf.mxu1  ;;  %v2502_v6 = vadd.f32 %v2486_v62, %v2320_v11  ;;  %v2035_v62 = vadd.f32 %v4187_v45, %v1931_v44  ;;  %v4384_v45 = vld [vmem:[#allocation16_spill] sm:$0xff] }
 0x296   : > { %v2603_v52 = vadd.f32 %v2584_v9, %v2499_v29  ;;  %v2605_v9 = vadd.f32 %v2588_v13, %v2501_v43  ;;  %v2038_v20 = vadd.f32 %v4195_v51, %v1934_v31  ;;  %v2219_v7 = vadd.f32 %v4203_v4, %v2037_v1  ;;  %v2905_v4 = vpop.permute.xlu1 %2904 }
 0x297   : > { %v4244_v23 = vpop.f32.mrf.mxu0  ;;  %v4246_v27 = vpop.f32.mrf.mxu1  ;;  %v2606_v32 = vadd.f32 %v2590_v54, %v2502_v6  ;;  %v2036_v13 = vadd.f32 %v4191_v47, %v1932_v3  ;;  %v2217_v36 = vadd.f32 %v4382_v19, %v2035_v62  ;;  %v4383_v54 = vld [vmem:[#allocation11_spill] sm:$0xff] }
 0x298   : > { %v2220_v25 = vadd.f32 %v4380_v18, %v2038_v20  ;;  %v2323_v28 = vadd.f32 %v4381_v33, %v2219_v7  ;;  %v2910_v20 = vpop.permute.xlu0 %2909  ;;  %v2951_v33 = vld [vmem:[%s354_s19] sm:$0xff] }
 0x299   : > { %v2598_v37 = vpop.f32.mrf.mxu1  ;;  %v2766_v57 = vpop.f32.mrf.mxu0  ;;  %v2218_v39 = vadd.f32 %v4383_v54, %v2036_v13 }
 0x29a   : > { %v2785_v59 = vadd.f32 %v2766_v57, %v2603_v52  ;;  %v2324_v38 = vadd.f32 %v4384_v45, %v2220_v25  ;;  %v2505_v47 = vadd.f32 %v4238_v10, %v2323_v28  ;;  %v2321_v57 = vadd.f32 %v4385_v49, %v2217_v36 }
 0x29b   : > { %v2600_v60 = vpop.f32.mrf.mxu1  ;;  %v2768_v58 = vpop.f32.mrf.mxu0  ;;  %v2322_v40 = vadd.f32 %v4386_v41, %v2218_v39 }
 0x29c   : > { %v2786_v50 = vadd.f32 %v2768_v58, %v2604_v53  ;;  %v2506_v30 = vadd.f32 %v4244_v23, %v2324_v38  ;;  %v2609_v58 = vadd.f32 %v2598_v37, %v2505_v47  ;;  %v2503_v43 = vadd.f32 %v4230_v61, %v2321_v57 }
 0x29d   : > { %v2770_v56 = vpop.f32.mrf.mxu0  ;;  %v2870_v0 = vpop.f32.mrf.mxu1  ;;  %v2504_v53 = vadd.f32 %v4234_v21, %v2322_v40 }
 0x29e   : > { %v2889_v35 = vadd.f32 %v2870_v0, %v2785_v59  ;;  %v2787_v48 = vadd.f32 %v2770_v56, %v2605_v9  ;;  %v2610_v31 = vadd.f32 %v2600_v60, %v2506_v30  ;;  %v2607_v0 = vadd.f32 %v4240_v15, %v2503_v43 }
 0x29f   : > { %v2772_v5 = vpop.f32.mrf.mxu0  ;;  %v2872_v46 = vpop.f32.mrf.mxu1  ;;  %v2608_v23 = vadd.f32 %v4246_v27, %v2504_v53 }
 0x2a0   : > { %v2917_v16 = vadd.f32 %v2900_v24, %v2889_v35  ;;  %v2890_v8 = vadd.f32 %v2872_v46, %v2786_v50  ;;  %v2788_v14 = vadd.f32 %v2772_v5, %v2606_v32  ;;  %v2915_v50 = vpop.permute.xlu1 %2914 }
 0x2a1   : > { %v2776_v26 = vpop.f32.mrf.mxu0  ;;  %v2874_v42 = vpop.f32.mrf.mxu1 }
 0x2a2   : > { %v2918_v51 = vadd.f32 %v2900_v24, %v2890_v8  ;;  %v2891_v34 = vadd.f32 %v2874_v42, %v2787_v48  ;;  %v2925_v2 = vmul.f32 0.5, %v2917_v16  ;;  %v2789_v61 = vadd.f32 %v2776_v26, %v2607_v0 }
 0x2a3   : > { %v2778_v12 = vpop.f32.mrf.mxu0  ;;  %v2876_v22 = vpop.f32.mrf.mxu1 }
 0x2a4   : > { %v2926_v17 = vmul.f32 0.5, %v2918_v51  ;;  %v2892_v29 = vadd.f32 %v2876_v22, %v2788_v14  ;;  %v2919_v63 = vadd.f32 %v2905_v4, %v2891_v34  ;;  %3440 = vtanh.f32 %v2925_v2  ;;  %v2952_v51 = vld [vmem:[%s354_s19 + $0x8] sm:$0xff]  ;;  %s3466_s19 = scalar_lea.vmem %s3465_s24, 512 }
 0x2a5   : > { %v2780_v52 = vpop.f32.mrf.mxu0  ;;  %v2880_v55 = vpop.f32.mrf.mxu1  ;;  %v2790_v35 = vadd.f32 %v2778_v12, %v2608_v23  ;;  %p3468_p1 = scmp.lt.s32.totalorder %s3466_s19, %s3460_s13 }
 0x2a6   : > { %v2920_v11 = vadd.f32 %v2905_v4, %v2892_v29  ;;  %v2933_v59 = vmul.f32 0.5, %v2919_v63  ;;  %3442 = vtanh.f32 %v2926_v17  ;;  %v2791_v56 = vadd.f32 %v2780_v52, %v2609_v58 }
 0x2a7   : > { %v2782_v10 = vpop.f32.mrf.mxu0  ;;  %v2882_v24 = vpop.f32.mrf.mxu1  ;;  %v2893_v3 = vadd.f32 %v2880_v55, %v2789_v61  ;;  %p3469_p2 = por %p3468_p1, %p3467_p0 }
 0x2a8   : > { %v2934_v1 = vmul.f32 0.5, %v2920_v11  ;;  %3444 = vtanh.f32 %v2933_v59  ;;  %v2792_v37 = vadd.f32 %v2782_v10, %v2610_v31  ;;  %v2894_v7 = vadd.f32 %v2882_v24, %v2790_v35 }
 0x2a9   : > { %v2884_v6 = vpop.f32.mrf.mxu1  ;;  %v2921_v15 = vadd.f32 %v2910_v20, %v2893_v3  ;;  %p3470_p3 = pnand %p3469_p2, %p3463_p13 }
 0x2aa   : > { %3446 = vtanh.f32 %v2934_v1  ;;  %v2895_v9 = vadd.f32 %v2884_v6, %v2791_v56  ;;  %v2922_v46 = vadd.f32 %v2910_v20, %v2894_v7 }
 0x2ab   : > { %v2886_v21 = vpop.f32.mrf.mxu1  ;;  %v2941_v48 = vmul.f32 0.5, %v2921_v15 }
 0x2ac   : > { %v2896_v44 = vadd.f32 %v2886_v21, %v2792_v37  ;;  %v2923_v60 = vadd.f32 %v2915_v50, %v2895_v9  ;;  %v2942_v8 = vmul.f32 0.5, %v2922_v46 }
 0x2ae   : > { %v2924_v5 = vadd.f32 %v2915_v50, %v2896_v44  ;;  %3448 = vtanh.f32 %v2923_v60 }
 0x2b0   : > { %3450 = vtanh.f32 %v2924_v5 }
 0x2b1   : > { %v3441_v27 = vpop.eup %3440  ;;  %3452 = vtanh.f32 %v2941_v48 }
 0x2b2   : > { %v2929_v13 = vadd.f32 1.0, %v3441_v27  ;;  %3454 = vtanh.f32 %v2942_v8 }
 0x2b3   : > { %v3443_v32 = vpop.eup %3442 }
 0x2b4   : > { %v2930_v25 = vadd.f32 1.0, %v3443_v32  ;;  %v2931_v14 = vmul.f32 0.5, %v2929_v13 }
 0x2b5   : > { %v3445_v16 = vpop.eup %3444 }
 0x2b6   : > { %v2937_v18 = vadd.f32 1.0, %v3445_v16  ;;  %v2932_v4 = vmul.f32 0.5, %v2930_v25 }
 0x2b7   : > { %v3447_v62 = vpop.eup %3446 }
 0x2b8   : > { %v2938_v26 = vadd.f32 1.0, %v3447_v62  ;;  %v2939_v42 = vmul.f32 0.5, %v2937_v18 }
 0x2ba   : > { %v2940_v28 = vmul.f32 0.5, %v2938_v26  ;;  %v2953_v36 = vmul.f32 %v2951_v33, %v2939_v42 }
 0x2bb   : > { %v3449_v34 = vpop.eup %3448 }
 0x2bc   : > { %v2955_v54 = vmul.f32 %v3449_v34, %v2931_v14  ;;  %v2954_v39 = vmul.f32 %v2952_v51, %v2940_v28 }
 0x2bd   : > { %v3451_v19 = vpop.eup %3450 }
 0x2be   : > { %v2956_v2 = vmul.f32 %v3451_v19, %v2932_v4  ;;  %v2957_v12 = vadd.f32 %v2955_v54, %v2953_v36 }
 0x2c0   : > { %v2958_v22 = vadd.f32 %v2956_v2, %v2954_v39  ;;  %3456 = vtanh.f32 %v2957_v12  ;;  %2965 = vst [vmem:[%s339_s12] sm:$0xff] %v2957_v12 }
 0x2c2   : > { %3458 = vtanh.f32 %v2958_v22  ;;  %2966 = vst [vmem:[%s339_s12 + $0x8] sm:$0xff] %v2958_v22 }
 0x2c3   : > { %3473 = shalt.err (!%p3470_p3)
}
 0x2c4   : > { %s3474_s12 = scalar_lea.hbm %s4292_s22, 256  ;;  %s3478_s17 = scalar_lea.hbm %s4368_s8, 512 }
 0x2c5   : > { %p3475_p4 = scmp.ne.s32.totalorder %s4292_s22, %s3474_s12  ;;  %p3479_p9 = scmp.lt.s32.totalorder %s4292_s22, %s4368_s8 }
 0x2c6   : > { %p3480_p10 = scmp.lt.s32.totalorder %s3478_s17, %s3474_s12 }
 0x2c7   : > { %p3476_p7 = pnand %p3475_p4, %p3648_p5 }
 0x2c8   : > { %p3481_p11 = por %p3480_p10, %p3479_p9 }
 0x2c9   : > { %p3477_p8 = pneg %p3476_p7 }
 0x2cb   : > { %p3482_p12 = pnand %p3481_p11, %p3477_p8 }
 0x2cd   : > { %3485 = shalt.err (!%p3482_p12)
}
 0x2ce   : > { %3348 = dma.vmem_to_hbm [thread:$0]  (%p3648_p5), %s4294_s21, 256, %s4292_s22, %s2973_s10   ;;  %v3453_v45 = vpop.eup %3452 }
 0x2cf   : > { %v3455_v38 = vpop.eup %3454  ;;  %v2945_v47 = vadd.f32 1.0, %v3453_v45  ;;  %s4387_s25 = sshll.u32 %s4278_s23, 4  ;;  %s4388_s24 = sshll.u32 %s3631_s9, 8 }
 0x2d0   : > { %v2946_v17 = vadd.f32 1.0, %v3455_v38  ;;  %s332_s18 = scalar_lea.vmem [#allocation4], %s4387_s25  ;;  %v3457_v49 = vpop.eup %3456  ;;  %s4324_s21 = scalar_lea.hbm %s4367_s7, %s4388_s24 }
 0x2d1   : > { %v2947_v29 = vmul.f32 0.5, %v2945_v47  ;;  %s2987_s13 = sshll.u32 %s332_s18, 4  ;;  %v3459_v41 = vpop.eup %3458  ;;  %s2968_s22 = scalar_lea.sflag [#allocation5], %s4278_s23  ;;  %s2988_s13 = int_to_ptr.vmem [resolvable:$true] %s2987_s13 }
 0x2d2   : > { %v2948_v57 = vmul.f32 0.5, %v2946_v17  ;;  %s3486_s10 = scalar_lea.vmem %s2988_s13, 256  ;;  %s3564_s20 = smov [#allocation4]  }
 0x2d3   : > { %v2961_v40 = vmul.f32 %v3457_v49, %v2947_v29  ;;  %p3487_p13 = scmp.ne.s32.totalorder %s2988_s13, %s3486_s10  ;;  %s3490_s26 = sshll.u32 %s3564_s20, 4  ;;  %s3491_s26 = int_to_ptr.vmem [resolvable:$false] %s3490_s26 }
 0x2d4   : > { %v2962_v63 = vmul.f32 %v3459_v41, %v2948_v57  ;;  %s3492_s17 = scalar_lea.vmem %s3491_s26, 512  ;;  %p3493_p2 = scmp.lt.s32.totalorder %s2988_s13, %s3491_s26 }
 0x2d5   : > { %2963 = vst [vmem:[%s332_s18] sm:$0xff] %v2961_v40  ;;  %p3488_p0 = pnand %p3487_p13, %p3648_p5  ;;  %p3494_p3 = scmp.lt.s32.totalorder %s3492_s17, %s3486_s10 }
 0x2d6   : > { %2964 = vst [vmem:[%s332_s18 + $0x8] sm:$0xff] %v2962_v63 }
 0x2d7   : > { %p3489_p1 = pneg %p3488_p0  ;;  %p3495_p4 = por %p3494_p3, %p3493_p2 }
 0x2d9   : > { %p3496_p7 = pnand %p3495_p4, %p3489_p1 }
 0x2db   : > { %3499 = shalt.err (!%p3496_p7)
}
 0x2dc   : > { %s3500_s9 = scalar_lea.hbm %s4324_s21, 256  ;;  %s3504_s18 = scalar_lea.hbm %s4367_s7, 512 }
 0x2dd   : > { %p3501_p8 = scmp.ne.s32.totalorder %s4324_s21, %s3500_s9  ;;  %p3505_p11 = scmp.lt.s32.totalorder %s4324_s21, %s4367_s7 }
 0x2de   : > { %p3506_p12 = scmp.lt.s32.totalorder %s3504_s18, %s3500_s9 }
 0x2df   : > { %p3502_p9 = pnand %p3501_p8, %p3648_p5 }
 0x2e0   : > { %p3507_p13 = por %p3506_p12, %p3505_p11 }
 0x2e1   : > { %p3503_p10 = pneg %p3502_p9 }
 0x2e3   : > { %p3508_p0 = pnand %p3507_p13, %p3503_p10 }
 0x2e5   : > { %3511 = shalt.err (!%p3508_p0)
}
 0x2e6   : > { %3347 = dma.vmem_to_hbm [thread:$0]  (%p3648_p5), %s2988_s13, 256, %s4324_s21, %s2968_s22  }
 0x2e7 PF: > { %p3358_p1 = scmp.ge.s32.totalorder %s3550_s30, 2  ;;  %s3013_s12 = sand.u32 1, %s3538_s27  }
 0x2e8   : > { %s3014_s10 = scalar_lea.sflag [#allocation5], %s3013_s12 }
 0x2e9   : > { %p3352_p2 = pnand %p3358_p1, %p3652_p6 }
 0x2eb   : > { %p3353_p3 = pneg %p3352_p2 }
 0x2ed   : > { %3529 = dma.done.wait (%p3353_p3), %s3014_s10, 256  }
 0x2ee   : > { %3531 = vsyncadd (%p3353_p3), %s3014_s10, 4294967040  ;;  %s3023_s20 = scalar_lea.sflag [#allocation7], %s3013_s12 }
 0x2ef   : > { %3533 = dma.done.wait (%p3353_p3), %s3023_s20, 256  }
 0x2f0   : > { %3535 = vsyncadd (%p3353_p3), %s3023_s20, 4294967040  ;;  %p22_p5 = scmp.ge.s32.totalorder %s3635_s11, 4   ;;  %s4389_s27 = smov %s3542_s28 }
 0x2f1   : > { %s4390_s28 = smov %s3546_s29  ;;  %s4391_s29 = smov %s3646_s14 }
 0x2f2   : > { %s4392_s30 = smov %s3635_s11  ;;  %24 = sbr.rel (!%p22_p5) target bundleno = 5 (0x5), region = 130 }
 0x2f7   :  { %3028 = vsyncpa [#allocation5], 1 }
 0x2f8   :  { %3030 = vsyncpa [#allocation5 + $0x1], 1 }
 0x2f9   :  { %3031 = vsyncpa [#allocation7], 1 }
 0x2fa   :  { %3033 = vsyncpa [#allocation7 + $0x1], 1 }

</bundles_post_ra>
